<compile_context>
chip_gen: v7x
topology: tpu7x:2x2x1
jax: 0.10.0
libtpu: 0.0.40
codegen_flags: <defaults>
</compile_context>

<pallas_src>
import jax
import jax.numpy as jnp
from jax import lax
from jax.experimental import pallas as pl
from jax.experimental.pallas import tpu as pltpu

EPS = 1e-5


# --------------------------------------------------------------------- conv1 (+conv3) --
def fused_convs_pallas(xph, w_flats, Ho, Wo, K):
    """Strided 'same' KxK conv(s) sharing one phase-split input.

    xph: (N, s, s, Hph, Wph, Cin) phase-split padded input, f32
    w_flats: list of (K*K*Cin, Cout) f32 weights (row order: kh, kw, cin)
    Returns, per conv: y (N, Ho*Wo, Cout), sum (N, 1, Cout), sumsq (N, 1, Cout).
    """
    N, s, _, Hph, Wph, Cin = xph.shape
    n_conv = len(w_flats)
    KK_Cin, Cout = w_flats[0].shape
    HoWo = Ho * Wo

    def kernel(*refs):
        x_ref = refs[0]
        w_refs = refs[1:1 + n_conv]
        out_refs = refs[1 + n_conv:]
        # im2col patch built once, shared by all convs (single matmul each).
        pieces = []
        for kh in range(K):
            for kw in range(K):
                phase = x_ref[0, kh % s, kw % s]                       # (Hph, Wph, Cin)
                patch = phase[kh // s:kh // s + Ho, kw // s:kw // s + Wo, :]
                pieces.append(patch.reshape(HoWo, Cin))
        cols = jnp.concatenate(pieces, axis=-1) if len(pieces) > 1 else pieces[0]
        for c in range(n_conv):
            y = jnp.dot(cols, w_refs[c][...], preferred_element_type=jnp.float32)
            out_refs[3 * c][0] = y                                      # (HoWo, Cout)
            out_refs[3 * c + 1][0] = jnp.sum(y, axis=0, keepdims=True)  # (1, Cout)
            out_refs[3 * c + 2][0] = jnp.sum(y * y, axis=0, keepdims=True)

    in_specs = [pl.BlockSpec((1, s, s, Hph, Wph, Cin),
                             lambda n: (n, 0, 0, 0, 0, 0))]
    in_specs += [pl.BlockSpec((KK_Cin, Cout), lambda n: (0, 0))] * n_conv

    out_shapes, out_specs = [], []
    for _ in range(n_conv):
        out_shapes += [jax.ShapeDtypeStruct((N, HoWo, Cout), jnp.float32),
                       jax.ShapeDtypeStruct((N, 1, Cout), jnp.float32),
                       jax.ShapeDtypeStruct((N, 1, Cout), jnp.float32)]
        out_specs += [pl.BlockSpec((1, HoWo, Cout), lambda n: (n, 0, 0)),
                      pl.BlockSpec((1, 1, Cout), lambda n: (n, 0, 0)),
                      pl.BlockSpec((1, 1, Cout), lambda n: (n, 0, 0))]

    return pl.pallas_call(
        kernel,
        out_shape=tuple(out_shapes),
        grid_spec=pltpu.PrefetchScalarGridSpec(
            num_scalar_prefetch=0, grid=(N,),
            in_specs=in_specs, out_specs=out_specs),
        compiler_params=pltpu.CompilerParams(dimension_semantics=("parallel",)),
    )(xph, *w_flats)


# -------------------------------------------------------- conv2 (BN1+ReLU fused in) ----
def conv2_fused_pallas(y1_pad, s1, b1, w2_flat, Ho, Wo, K):
    """Stride-1 'same' KxK conv whose prologue applies relu(y*scale+bias) (BN1 + ReLU).

    y1_pad: (N, Ho+2p, Wo+2p, C) zero-padded pre-BN conv1 output
    s1, b1: (1, 1, C) BN1 scale / bias
    w2_flat: (K*K*C, Cout)
    Returns y2 (N, Ho*Wo, Cout), sum (N, 1, Cout), sumsq (N, 1, Cout).
    """
    N, Hp2, Wp2, C = y1_pad.shape
    KK_C, Cout = w2_flat.shape
    pad = K // 2
    HoWo = Ho * Wo

    def kernel(y_ref, s_ref, b_ref, w_ref, o_ref, sum_ref, sq_ref):
        yp = y_ref[0]                                        # (Hp2, Wp2, C)
        sv = s_ref[...]                                      # (1, 1, C)
        bv = b_ref[...]
        # BN1-apply + ReLU, masked so the zero halo stays exactly zero.
        ri = lax.broadcasted_iota(jnp.int32, (Hp2, Wp2, C), 0)
        ci = lax.broadcasted_iota(jnp.int32, (Hp2, Wp2, C), 1)
        interior = ((ri >= pad) & (ri < pad + Ho) &
                    (ci >= pad) & (ci < pad + Wo))
        z = jnp.where(interior, jnp.maximum(yp * sv + bv, 0.0), 0.0)
        pieces = []
        for kh in range(K):
            for kw in range(K):
                pieces.append(z[kh:kh + Ho, kw:kw + Wo, :].reshape(HoWo, C))
        cols = jnp.concatenate(pieces, axis=-1) if len(pieces) > 1 else pieces[0]
        y2 = jnp.dot(cols, w_ref[...], preferred_element_type=jnp.float32)
        o_ref[0] = y2
        sum_ref[0] = jnp.sum(y2, axis=0, keepdims=True)
        sq_ref[0] = jnp.sum(y2 * y2, axis=0, keepdims=True)

    return pl.pallas_call(
        kernel,
        out_shape=(jax.ShapeDtypeStruct((N, HoWo, Cout), jnp.float32),
                   jax.ShapeDtypeStruct((N, 1, Cout), jnp.float32),
                   jax.ShapeDtypeStruct((N, 1, Cout), jnp.float32)),
        grid_spec=pltpu.PrefetchScalarGridSpec(
            num_scalar_prefetch=0, grid=(N,),
            in_specs=[pl.BlockSpec((1, Hp2, Wp2, C), lambda n: (n, 0, 0, 0)),
                      pl.BlockSpec((1, 1, C), lambda n: (0, 0, 0)),
                      pl.BlockSpec((1, 1, C), lambda n: (0, 0, 0)),
                      pl.BlockSpec((KK_C, Cout), lambda n: (0, 0))],
            out_specs=[pl.BlockSpec((1, HoWo, Cout), lambda n: (n, 0, 0)),
                       pl.BlockSpec((1, 1, Cout), lambda n: (n, 0, 0)),
                       pl.BlockSpec((1, 1, Cout), lambda n: (n, 0, 0))]),
        compiler_params=pltpu.CompilerParams(dimension_semantics=("parallel",)),
    )(y1_pad, s1, b1, w2_flat)


# ------------------------------------------------ fused BN2 + BN3 + add + ReLU (lane-dense)
def _pick_row_tile(rows):
    for t in (1024, 512, 256, 128, 64, 32, 16, 8):
        if rows % t == 0:
            return t
    return rows


def bn_add_relu_pallas(a2d, sa, ba, b2d, sb, bb):
    """relu( (a*sa+ba) + (b*sb+bb) ) on lane-dense (rows, L) views, L a multiple of C."""
    R, L = a2d.shape
    rt = _pick_row_tile(R)

    def kernel(a_ref, sa_ref, ba_ref, b_ref, sb_ref, bb_ref, o_ref):
        o_ref[...] = jnp.maximum(
            a_ref[...] * sa_ref[...] + ba_ref[...] +
            b_ref[...] * sb_ref[...] + bb_ref[...], 0.0)

    return pl.pallas_call(
        kernel,
        out_shape=jax.ShapeDtypeStruct((R, L), jnp.float32),
        grid_spec=pltpu.PrefetchScalarGridSpec(
            num_scalar_prefetch=0, grid=(R // rt,),
            in_specs=[pl.BlockSpec((rt, L), lambda r: (r, 0)),
                      pl.BlockSpec((1, L), lambda r: (0, 0)),
                      pl.BlockSpec((1, L), lambda r: (0, 0)),
                      pl.BlockSpec((rt, L), lambda r: (r, 0)),
                      pl.BlockSpec((1, L), lambda r: (0, 0)),
                      pl.BlockSpec((1, L), lambda r: (0, 0))],
            out_specs=pl.BlockSpec((rt, L), lambda r: (r, 0))),
        compiler_params=pltpu.CompilerParams(dimension_semantics=("parallel",)),
    )(a2d, sa, ba, b2d, sb, bb)


# ------------------------------------------------------------------------------- glue --
def _bn_scale_bias_from_stats(ssum, ssq, count, gamma, beta, eps=EPS):
    """PyTorch training-mode BN (biased variance) as per-channel scale/bias."""
    mean = ssum / count
    var = jnp.maximum(ssq / count - mean * mean, 0.0)
    scale = gamma.astype(jnp.float32) * lax.rsqrt(var + eps)
    bias = beta.astype(jnp.float32) - mean * scale
    return scale, bias


def _fold_lanes(flat, C):
    """View a channel-minor flat activation as (rows, L) with L lane-dense."""
    total = flat.size
    if 128 % C == 0 and total % 128 == 0:
        L = 128
    else:
        # TODO(synk): lane-sparse fallback for channel counts that don't divide 128.
        L = C
    return flat.reshape(total // L, L)


def res_2d_forward(x_nchw, params, stride):
    """Forward pass of Res_2d.  x_nchw: (N, Cin, H, W) float32.  Returns NCHW."""
    x = jnp.transpose(x_nchw, (0, 2, 3, 1)).astype(jnp.float32)      # -> NHWC (once)
    N, H, W, Cin = x.shape
    K = params["w1"].shape[0]
    Cout = params["w1"].shape[-1]
    pad = K // 2
    s = stride
    Ho = (H + 2 * pad - K) // s + 1
    Wo = (W + 2 * pad - K) // s + 1
    HoWo = Ho * Wo
    count = float(N * HoWo)

    # Space-to-depth phase split of the padded input (single glue transpose, shared
    # between conv1 and the conv3 shortcut).
    xp = jnp.pad(x, ((0, 0), (pad, pad), (pad, pad), (0, 0)))
    Hp, Wp = xp.shape[1], xp.shape[2]
    Hps = -(-Hp // s) * s
    Wps = -(-Wp // s) * s
    xp = jnp.pad(xp, ((0, 0), (0, Hps - Hp), (0, Wps - Wp), (0, 0)))
    xph = xp.reshape(N, Hps // s, s, Wps // s, s, Cin).transpose(0, 2, 4, 1, 3, 5)

    diff = params["w3"] is not None
    # Conv biases are dropped: they cancel exactly in training-mode BN mean subtraction.
    w_flats = [params["w1"].reshape(K * K * Cin, Cout).astype(jnp.float32)]
    if diff:
        w_flats.append(params["w3"].reshape(K * K * Cin, Cout).astype(jnp.float32))

    outs = fused_convs_pallas(xph, w_flats, Ho, Wo, K)
    y1, sum1, sq1 = outs[0], outs[1], outs[2]
    s1, b1 = _bn_scale_bias_from_stats(jnp.sum(sum1, axis=(0, 1)),
                                       jnp.sum(sq1, axis=(0, 1)), count,
                                       params["g1"], params["be1"])

    # conv2 with BN1-apply + ReLU fused into its prologue.
    y1_pad = jnp.pad(y1.reshape(N, Ho, Wo, Cout),
                     ((0, 0), (pad, pad), (pad, pad), (0, 0)))
    w2f = params["w2"].reshape(K * K * Cout, Cout).astype(jnp.float32)
    y2, sum2, sq2 = conv2_fused_pallas(y1_pad, s1.reshape(1, 1, Cout),
                                       b1.reshape(1, 1, Cout), w2f, Ho, Wo, K)
    s2, b2 = _bn_scale_bias_from_stats(jnp.sum(sum2, axis=(0, 1)),
                                       jnp.sum(sq2, axis=(0, 1)), count,
                                       params["g2"], params["be2"])

    if diff:
        y3, sum3, sq3 = outs[3], outs[4], outs[5]
        s3, b3 = _bn_scale_bias_from_stats(jnp.sum(sum3, axis=(0, 1)),
                                           jnp.sum(sq3, axis=(0, 1)), count,
                                           params["g3"], params["be3"])
        short_flat = y3.reshape(-1)
    else:
        s3 = jnp.ones((Cout,), jnp.float32)
        b3 = jnp.zeros((Cout,), jnp.float32)
        short_flat = x.reshape(-1)          # identity shortcut (same shape by construction)

    # Fused BN2 + BN3 + residual add + ReLU, lane-folded to 128-wide rows (metadata-only
    # reshapes of contiguous channel-minor buffers).
    main2d = _fold_lanes(y2.reshape(-1), Cout)
    short2d = _fold_lanes(short_flat, Cout)
    L = main2d.shape[1]
    reps = L // Cout

    def tile_vec(v):
        return jnp.tile(v.astype(jnp.float32), reps).reshape(1, L)

    out2d = bn_add_relu_pallas(main2d, tile_vec(s2), tile_vec(b2),
                               short2d, tile_vec(s3), tile_vec(b3))
    out = out2d.reshape(N, Ho, Wo, Cout).transpose(0, 3, 1, 2)        # -> NCHW
    return out


# -------------------------------------------------------------------- pure-JAX reference
def ref_forward(x_nchw, params, stride, eps=EPS):
    def conv(x, w_hwio, b, s):
        w_oihw = jnp.transpose(w_hwio, (3, 2, 0, 1))
        out = lax.conv_general_dilated(x, w_oihw, (s, s), ((1, 1), (1, 1)),
                                       dimension_numbers=("NCHW", "OIHW", "NCHW"))
        return out + b.reshape(1, -1, 1, 1)

    def bn(y, g, be):
        mean = jnp.mean(y, axis=(0, 2, 3), keepdims=True)
        var = jnp.mean((y - mean) ** 2, axis=(0, 2, 3), keepdims=True)
        return (y - mean) / jnp.sqrt(var + eps) * g.reshape(1, -1, 1, 1) + be.reshape(1, -1, 1, 1)

    out = jnp.maximum(bn(conv(x_nchw, params["w1"], params["b1"], stride),
                         params["g1"], params["be1"]), 0.0)
    out = bn(conv(out, params["w2"], params["b2"], 1), params["g2"], params["be2"])
    if params["w3"] is not None:
        sc = bn(conv(x_nchw, params["w3"], params["b3"], stride), params["g3"], params["be3"])
    else:
        sc = x_nchw
    return jnp.maximum(out + sc, 0.0)


# ------------------------------------------------------------------------------- main --
if __name__ == "__main__":
    N, Cin, H, W = 2, 4, 16, 16
    Cout, K, stride = 8, 3, 2

    key = jax.random.PRNGKey(0)
    kx, kp = jax.random.split(key)
    x = jax.random.normal(kx, (N, Cin, H, W), jnp.float32)

    ks = jax.random.split(kp, 6)
    params = {
        # conv weights stored HWIO (K, K, Cin, Cout); biases kept for the reference path
        # (they cancel exactly under training-mode BN, so the Pallas path omits them).
        "w1": 0.1 * jax.random.normal(ks[0], (K, K, Cin, Cout), jnp.float32),
        "b1": 0.1 * jax.random.normal(ks[1], (Cout,), jnp.float32),
        "g1": jnp.ones((Cout,), jnp.float32), "be1": jnp.zeros((Cout,), jnp.float32),
        "w2": 0.1 * jax.random.normal(ks[2], (K, K, Cout, Cout), jnp.float32),
        "b2": 0.1 * jax.random.normal(ks[3], (Cout,), jnp.float32),
        "g2": jnp.ones((Cout,), jnp.float32), "be2": jnp.zeros((Cout,), jnp.float32),
        # diff=True branch (stride != 1 or Cin != Cout)
        "w3": 0.1 * jax.random.normal(ks[4], (K, K, Cin, Cout), jnp.float32),
        "b3": 0.1 * jax.random.normal(ks[5], (Cout,), jnp.float32),
        "g3": jnp.ones((Cout,), jnp.float32), "be3": jnp.zeros((Cout,), jnp.float32),
    }

    out = res_2d_forward(x, params, stride)
    out = jax.block_until_ready(out)
    assert out.shape == (N, Cout, H // stride, W // stride), out.shape

    ref = jax.block_until_ready(ref_forward(x, params, stride))
    if not jnp.allclose(out, ref, atol=1e-3, rtol=1e-3):
        max_err = float(jnp.max(jnp.abs(out - ref)))
        raise AssertionError(f"Pallas output mismatch vs reference, max abs err={max_err}")

    print("KERNEL_OK")
</pallas_src>

<mosaic_0001>
module attributes {stable_mosaic.version = 11 : i64} {
  func.func @kernel(%arg0: i32, %arg1: memref<1x2x2x9x9x4xf32, #tpu.memory_space<vmem>>, %arg2: memref<36x8xf32, #tpu.memory_space<vmem>>, %arg3: memref<36x8xf32, #tpu.memory_space<vmem>>, %arg4: memref<1x64x8xf32, #tpu.memory_space<vmem>>, %arg5: memref<1x1x8xf32, #tpu.memory_space<vmem>>, %arg6: memref<1x1x8xf32, #tpu.memory_space<vmem>>, %arg7: memref<1x64x8xf32, #tpu.memory_space<vmem>>, %arg8: memref<1x1x8xf32, #tpu.memory_space<vmem>>, %arg9: memref<1x1x8xf32, #tpu.memory_space<vmem>>) attributes {dimension_semantics = [#tpu.dimension_semantics<parallel>], iteration_bounds = array<i64: 2>, scalar_prefetch = 0 : i64, scratch_operands = 0 : i64, tpu.core_type = #tpu.core_type<tc>, window_params = [{transform_indices = @transform_0, window_bounds = array<i64: 1, 2, 2, 9, 9, 4>}, {pipeline_mode = #tpu.pipeline_mode<synchronous>, transform_indices = @transform_1, window_bounds = array<i64: 36, 8>}, {pipeline_mode = #tpu.pipeline_mode<synchronous>, transform_indices = @transform_2, window_bounds = array<i64: 36, 8>}, {transform_indices = @transform_3, window_bounds = array<i64: 1, 64, 8>}, {transform_indices = @transform_4, window_bounds = array<i64: 1, 1, 8>}, {transform_indices = @transform_5, window_bounds = array<i64: 1, 1, 8>}, {transform_indices = @transform_6, window_bounds = array<i64: 1, 64, 8>}, {transform_indices = @transform_7, window_bounds = array<i64: 1, 1, 8>}, {transform_indices = @transform_8, window_bounds = array<i64: 1, 1, 8>}]} {
    %c0 = arith.constant 0 : index
    %c0_0 = arith.constant 0 : index
    %c0_1 = arith.constant 0 : index
    %c0_2 = arith.constant 0 : index
    %c0_3 = arith.constant 0 : index
    %c0_4 = arith.constant 0 : index
    %0 = vector.load %arg1[%c0, %c0_0, %c0_1, %c0_2, %c0_3, %c0_4] : memref<1x2x2x9x9x4xf32, #tpu.memory_space<vmem>>, vector<1x1x1x9x9x4xf32>
    %1 = vector.shape_cast %0 : vector<1x1x1x9x9x4xf32> to vector<9x9x4xf32>
    %2 = vector.extract_strided_slice %1 {offsets = [0, 0, 0], sizes = [8, 8, 4], strides = [1, 1, 1]} : vector<9x9x4xf32> to vector<8x8x4xf32>
    %3 = vector.shape_cast %2 : vector<8x8x4xf32> to vector<64x4xf32>
    %c0_5 = arith.constant 0 : index
    %c0_6 = arith.constant 0 : index
    %c1 = arith.constant 1 : index
    %c0_7 = arith.constant 0 : index
    %c0_8 = arith.constant 0 : index
    %c0_9 = arith.constant 0 : index
    %4 = vector.load %arg1[%c0_5, %c0_6, %c1, %c0_7, %c0_8, %c0_9] : memref<1x2x2x9x9x4xf32, #tpu.memory_space<vmem>>, vector<1x1x1x9x9x4xf32>
    %5 = vector.shape_cast %4 : vector<1x1x1x9x9x4xf32> to vector<9x9x4xf32>
    %6 = vector.extract_strided_slice %5 {offsets = [0, 0, 0], sizes = [8, 8, 4], strides = [1, 1, 1]} : vector<9x9x4xf32> to vector<8x8x4xf32>
    %7 = vector.shape_cast %6 : vector<8x8x4xf32> to vector<64x4xf32>
    %c0_10 = arith.constant 0 : index
    %c0_11 = arith.constant 0 : index
    %c0_12 = arith.constant 0 : index
    %c0_13 = arith.constant 0 : index
    %c0_14 = arith.constant 0 : index
    %c0_15 = arith.constant 0 : index
    %8 = vector.load %arg1[%c0_10, %c0_11, %c0_12, %c0_13, %c0_14, %c0_15] : memref<1x2x2x9x9x4xf32, #tpu.memory_space<vmem>>, vector<1x1x1x9x9x4xf32>
    %9 = vector.shape_cast %8 : vector<1x1x1x9x9x4xf32> to vector<9x9x4xf32>
    %10 = vector.extract_strided_slice %9 {offsets = [0, 1, 0], sizes = [8, 8, 4], strides = [1, 1, 1]} : vector<9x9x4xf32> to vector<8x8x4xf32>
    %11 = vector.shape_cast %10 : vector<8x8x4xf32> to vector<64x4xf32>
    %c0_16 = arith.constant 0 : index
    %c1_17 = arith.constant 1 : index
    %c0_18 = arith.constant 0 : index
    %c0_19 = arith.constant 0 : index
    %c0_20 = arith.constant 0 : index
    %c0_21 = arith.constant 0 : index
    %12 = vector.load %arg1[%c0_16, %c1_17, %c0_18, %c0_19, %c0_20, %c0_21] : memref<1x2x2x9x9x4xf32, #tpu.memory_space<vmem>>, vector<1x1x1x9x9x4xf32>
    %13 = vector.shape_cast %12 : vector<1x1x1x9x9x4xf32> to vector<9x9x4xf32>
    %14 = vector.extract_strided_slice %13 {offsets = [0, 0, 0], sizes = [8, 8, 4], strides = [1, 1, 1]} : vector<9x9x4xf32> to vector<8x8x4xf32>
    %15 = vector.shape_cast %14 : vector<8x8x4xf32> to vector<64x4xf32>
    %c0_22 = arith.constant 0 : index
    %c1_23 = arith.constant 1 : index
    %c1_24 = arith.constant 1 : index
    %c0_25 = arith.constant 0 : index
    %c0_26 = arith.constant 0 : index
    %c0_27 = arith.constant 0 : index
    %16 = vector.load %arg1[%c0_22, %c1_23, %c1_24, %c0_25, %c0_26, %c0_27] : memref<1x2x2x9x9x4xf32, #tpu.memory_space<vmem>>, vector<1x1x1x9x9x4xf32>
    %17 = vector.shape_cast %16 : vector<1x1x1x9x9x4xf32> to vector<9x9x4xf32>
    %18 = vector.extract_strided_slice %17 {offsets = [0, 0, 0], sizes = [8, 8, 4], strides = [1, 1, 1]} : vector<9x9x4xf32> to vector<8x8x4xf32>
    %19 = vector.shape_cast %18 : vector<8x8x4xf32> to vector<64x4xf32>
    %c0_28 = arith.constant 0 : index
    %c1_29 = arith.constant 1 : index
    %c0_30 = arith.constant 0 : index
    %c0_31 = arith.constant 0 : index
    %c0_32 = arith.constant 0 : index
    %c0_33 = arith.constant 0 : index
    %20 = vector.load %arg1[%c0_28, %c1_29, %c0_30, %c0_31, %c0_32, %c0_33] : memref<1x2x2x9x9x4xf32, #tpu.memory_space<vmem>>, vector<1x1x1x9x9x4xf32>
    %21 = vector.shape_cast %20 : vector<1x1x1x9x9x4xf32> to vector<9x9x4xf32>
    %22 = vector.extract_strided_slice %21 {offsets = [0, 1, 0], sizes = [8, 8, 4], strides = [1, 1, 1]} : vector<9x9x4xf32> to vector<8x8x4xf32>
    %23 = vector.shape_cast %22 : vector<8x8x4xf32> to vector<64x4xf32>
    %c0_34 = arith.constant 0 : index
    %c0_35 = arith.constant 0 : index
    %c0_36 = arith.constant 0 : index
    %c0_37 = arith.constant 0 : index
    %c0_38 = arith.constant 0 : index
    %c0_39 = arith.constant 0 : index
    %24 = vector.load %arg1[%c0_34, %c0_35, %c0_36, %c0_37, %c0_38, %c0_39] : memref<1x2x2x9x9x4xf32, #tpu.memory_space<vmem>>, vector<1x1x1x9x9x4xf32>
    %25 = vector.shape_cast %24 : vector<1x1x1x9x9x4xf32> to vector<9x9x4xf32>
    %26 = vector.extract_strided_slice %25 {offsets = [1, 0, 0], sizes = [8, 8, 4], strides = [1, 1, 1]} : vector<9x9x4xf32> to vector<8x8x4xf32>
    %27 = vector.shape_cast %26 : vector<8x8x4xf32> to vector<64x4xf32>
    %c0_40 = arith.constant 0 : index
    %c0_41 = arith.constant 0 : index
    %c1_42 = arith.constant 1 : index
    %c0_43 = arith.constant 0 : index
    %c0_44 = arith.constant 0 : index
    %c0_45 = arith.constant 0 : index
    %28 = vector.load %arg1[%c0_40, %c0_41, %c1_42, %c0_43, %c0_44, %c0_45] : memref<1x2x2x9x9x4xf32, #tpu.memory_space<vmem>>, vector<1x1x1x9x9x4xf32>
    %29 = vector.shape_cast %28 : vector<1x1x1x9x9x4xf32> to vector<9x9x4xf32>
    %30 = vector.extract_strided_slice %29 {offsets = [1, 0, 0], sizes = [8, 8, 4], strides = [1, 1, 1]} : vector<9x9x4xf32> to vector<8x8x4xf32>
    %31 = vector.shape_cast %30 : vector<8x8x4xf32> to vector<64x4xf32>
    %c0_46 = arith.constant 0 : index
    %c0_47 = arith.constant 0 : index
    %c0_48 = arith.constant 0 : index
    %c0_49 = arith.constant 0 : index
    %c0_50 = arith.constant 0 : index
    %c0_51 = arith.constant 0 : index
    %32 = vector.load %arg1[%c0_46, %c0_47, %c0_48, %c0_49, %c0_50, %c0_51] : memref<1x2x2x9x9x4xf32, #tpu.memory_space<vmem>>, vector<1x1x1x9x9x4xf32>
    %33 = vector.shape_cast %32 : vector<1x1x1x9x9x4xf32> to vector<9x9x4xf32>
    %34 = vector.extract_strided_slice %33 {offsets = [1, 1, 0], sizes = [8, 8, 4], strides = [1, 1, 1]} : vector<9x9x4xf32> to vector<8x8x4xf32>
    %35 = vector.shape_cast %34 : vector<8x8x4xf32> to vector<64x4xf32>
    %36 = tpu.concatenate %3, %7, %11, %15, %19, %23, %27, %31, %35 in 1 : vector<64x4xf32>, vector<64x4xf32>, vector<64x4xf32>, vector<64x4xf32>, vector<64x4xf32>, vector<64x4xf32>, vector<64x4xf32>, vector<64x4xf32>, vector<64x4xf32> -> vector<64x36xf32>
    %c0_52 = arith.constant 0 : index
    %c0_53 = arith.constant 0 : index
    %37 = vector.load %arg2[%c0_52, %c0_53] : memref<36x8xf32, #tpu.memory_space<vmem>>, vector<36x8xf32>
    %cst = arith.constant dense<0.000000e+00> : vector<64x8xf32>
    %38 = tpu.matmul %36, %37, %cst {dimension_numbers = #tpu.dot_dimension_numbers<[1], [0], [0], [1], [0, 0, 1, 1], [], []>} : vector<64x36xf32>, vector<36x8xf32>, vector<64x8xf32> -> vector<64x8xf32>
    %c0_54 = arith.constant 0 : index
    %c0_55 = arith.constant 0 : index
    %c0_56 = arith.constant 0 : index
    %39 = vector.load %arg4[%c0_54, %c0_55, %c0_56] : memref<1x64x8xf32, #tpu.memory_space<vmem>>, vector<1x64x8xf32>
    %40 = vector.shape_cast %39 : vector<1x64x8xf32> to vector<64x8xf32>
    %41 = vector.shape_cast %38 : vector<64x8xf32> to vector<1x64x8xf32>
    tpu.vector_store %arg4[%c0_54, %c0_55, %c0_56], %41 {strides = array<i32>} : memref<1x64x8xf32, #tpu.memory_space<vmem>>, vector<1x64x8xf32>,
    %cst_57 = arith.constant dense<0.000000e+00> : vector<8xf32>
    %42 = vector.multi_reduction <add>, %38, %cst_57 [0] : vector<64x8xf32> to vector<8xf32>
    %43 = vector.shape_cast %42 : vector<8xf32> to vector<1x8xf32>
    %c0_58 = arith.constant 0 : index
    %c0_59 = arith.constant 0 : index
    %c0_60 = arith.constant 0 : index
    %44 = vector.load %arg5[%c0_58, %c0_59, %c0_60] : memref<1x1x8xf32, #tpu.memory_space<vmem>>, vector<1x1x8xf32>
    %45 = vector.shape_cast %44 : vector<1x1x8xf32> to vector<1x8xf32>
    %46 = vector.shape_cast %43 : vector<1x8xf32> to vector<1x1x8xf32>
    tpu.vector_store %arg5[%c0_58, %c0_59, %c0_60], %46 {strides = array<i32>} : memref<1x1x8xf32, #tpu.memory_space<vmem>>, vector<1x1x8xf32>,
    %47 = arith.mulf %38, %38 : vector<64x8xf32>
    %cst_61 = arith.constant dense<0.000000e+00> : vector<8xf32>
    %48 = vector.multi_reduction <add>, %47, %cst_61 [0] : vector<64x8xf32> to vector<8xf32>
    %49 = vector.shape_cast %48 : vector<8xf32> to vector<1x8xf32>
    %c0_62 = arith.constant 0 : index
    %c0_63 = arith.constant 0 : index
    %c0_64 = arith.constant 0 : index
    %50 = vector.load %arg6[%c0_62, %c0_63, %c0_64] : memref<1x1x8xf32, #tpu.memory_space<vmem>>, vector<1x1x8xf32>
    %51 = vector.shape_cast %50 : vector<1x1x8xf32> to vector<1x8xf32>
    %52 = vector.shape_cast %49 : vector<1x8xf32> to vector<1x1x8xf32>
    tpu.vector_store %arg6[%c0_62, %c0_63, %c0_64], %52 {strides = array<i32>} : memref<1x1x8xf32, #tpu.memory_space<vmem>>, vector<1x1x8xf32>,
    %c0_65 = arith.constant 0 : index
    %c0_66 = arith.constant 0 : index
    %53 = vector.load %arg3[%c0_65, %c0_66] : memref<36x8xf32, #tpu.memory_space<vmem>>, vector<36x8xf32>
    %cst_67 = arith.constant dense<0.000000e+00> : vector<64x8xf32>
    %54 = tpu.matmul %36, %53, %cst_67 {dimension_numbers = #tpu.dot_dimension_numbers<[1], [0], [0], [1], [0, 0, 1, 1], [], []>} : vector<64x36xf32>, vector<36x8xf32>, vector<64x8xf32> -> vector<64x8xf32>
    %c0_68 = arith.constant 0 : index
    %c0_69 = arith.constant 0 : index
    %c0_70 = arith.constant 0 : index
    %55 = vector.load %arg7[%c0_68, %c0_69, %c0_70] : memref<1x64x8xf32, #tpu.memory_space<vmem>>, vector<1x64x8xf32>
    %56 = vector.shape_cast %55 : vector<1x64x8xf32> to vector<64x8xf32>
    %57 = vector.shape_cast %54 : vector<64x8xf32> to vector<1x64x8xf32>
    tpu.vector_store %arg7[%c0_68, %c0_69, %c0_70], %57 {strides = array<i32>} : memref<1x64x8xf32, #tpu.memory_space<vmem>>, vector<1x64x8xf32>,
    %cst_71 = arith.constant dense<0.000000e+00> : vector<8xf32>
    %58 = vector.multi_reduction <add>, %54, %cst_71 [0] : vector<64x8xf32> to vector<8xf32>
    %59 = vector.shape_cast %58 : vector<8xf32> to vector<1x8xf32>
    %c0_72 = arith.constant 0 : index
    %c0_73 = arith.constant 0 : index
    %c0_74 = arith.constant 0 : index
    %60 = vector.load %arg8[%c0_72, %c0_73, %c0_74] : memref<1x1x8xf32, #tpu.memory_space<vmem>>, vector<1x1x8xf32>
    %61 = vector.shape_cast %60 : vector<1x1x8xf32> to vector<1x8xf32>
    %62 = vector.shape_cast %59 : vector<1x8xf32> to vector<1x1x8xf32>
    tpu.vector_store %arg8[%c0_72, %c0_73, %c0_74], %62 {strides = array<i32>} : memref<1x1x8xf32, #tpu.memory_space<vmem>>, vector<1x1x8xf32>,
    %63 = arith.mulf %54, %54 : vector<64x8xf32>
    %cst_75 = arith.constant dense<0.000000e+00> : vector<8xf32>
    %64 = vector.multi_reduction <add>, %63, %cst_75 [0] : vector<64x8xf32> to vector<8xf32>
    %65 = vector.shape_cast %64 : vector<8xf32> to vector<1x8xf32>
    %c0_76 = arith.constant 0 : index
    %c0_77 = arith.constant 0 : index
    %c0_78 = arith.constant 0 : index
    %66 = vector.load %arg9[%c0_76, %c0_77, %c0_78] : memref<1x1x8xf32, #tpu.memory_space<vmem>>, vector<1x1x8xf32>
    %67 = vector.shape_cast %66 : vector<1x1x8xf32> to vector<1x8xf32>
    %68 = vector.shape_cast %65 : vector<1x8xf32> to vector<1x1x8xf32>
    tpu.vector_store %arg9[%c0_76, %c0_77, %c0_78], %68 {strides = array<i32>} : memref<1x1x8xf32, #tpu.memory_space<vmem>>, vector<1x1x8xf32>,
    return
  }
  func.func @transform_0(%arg0: i32) -> (i32, i32, i32, i32, i32, i32) {
    %c0_i32 = arith.constant 0 : i32
    %c0_i32_0 = arith.constant 0 : i32
    %c0_i32_1 = arith.constant 0 : i32
    %c0_i32_2 = arith.constant 0 : i32
    %c0_i32_3 = arith.constant 0 : i32
    %c0_i32_4 = arith.constant 0 : i32
    return %arg0, %c0_i32, %c0_i32_0, %c0_i32_1, %c0_i32_2, %c0_i32_3 : i32, i32, i32, i32, i32, i32
  }
  func.func @transform_1(%arg0: i32) -> (i32, i32) {
    %c0_i32 = arith.constant 0 : i32
    %c0_i32_0 = arith.constant 0 : i32
    %c0_i32_1 = arith.constant 0 : i32
    return %c0_i32, %c0_i32_0 : i32, i32
  }
  func.func @transform_2(%arg0: i32) -> (i32, i32) {
    %c0_i32 = arith.constant 0 : i32
    %c0_i32_0 = arith.constant 0 : i32
    %c0_i32_1 = arith.constant 0 : i32
    return %c0_i32, %c0_i32_0 : i32, i32
  }
  func.func @transform_3(%arg0: i32) -> (i32, i32, i32) {
    %c0_i32 = arith.constant 0 : i32
    %c0_i32_0 = arith.constant 0 : i32
    %c0_i32_1 = arith.constant 0 : i32
    return %arg0, %c0_i32, %c0_i32_0 : i32, i32, i32
  }
  func.func @transform_4(%arg0: i32) -> (i32, i32, i32) {
    %c0_i32 = arith.constant 0 : i32
    %c0_i32_0 = arith.constant 0 : i32
    %c0_i32_1 = arith.constant 0 : i32
    return %arg0, %c0_i32, %c0_i32_0 : i32, i32, i32
  }
  func.func @transform_5(%arg0: i32) -> (i32, i32, i32) {
    %c0_i32 = arith.constant 0 : i32
    %c0_i32_0 = arith.constant 0 : i32
    %c0_i32_1 = arith.constant 0 : i32
    return %arg0, %c0_i32, %c0_i32_0 : i32, i32, i32
  }
  func.func @transform_6(%arg0: i32) -> (i32, i32, i32) {
    %c0_i32 = arith.constant 0 : i32
    %c0_i32_0 = arith.constant 0 : i32
    %c0_i32_1 = arith.constant 0 : i32
    return %arg0, %c0_i32, %c0_i32_0 : i32, i32, i32
  }
  func.func @transform_7(%arg0: i32) -> (i32, i32, i32) {
    %c0_i32 = arith.constant 0 : i32
    %c0_i32_0 = arith.constant 0 : i32
    %c0_i32_1 = arith.constant 0 : i32
    return %arg0, %c0_i32, %c0_i32_0 : i32, i32, i32
  }
  func.func @transform_8(%arg0: i32) -> (i32, i32, i32) {
    %c0_i32 = arith.constant 0 : i32
    %c0_i32_0 = arith.constant 0 : i32
    %c0_i32_1 = arith.constant 0 : i32
    return %arg0, %c0_i32, %c0_i32_0 : i32, i32, i32
  }
}

</mosaic_0001>

<bundles_post_ra>
// kernel: tpu_custom_call.1
= control target key start
LH: loop header
LB: loop body
LE: loop exit
PB: predicated region body
PF: predicated region fallthrough
CT: control target
= control target key end

     0   :  { %s2504_s0 = inlined_call_operand.vmem [shape: f32[2,2,2,9,9,4], index: 0, kind: input, shape index: {}]   ;;  %s2505_s1 = inlined_call_operand.vmem [shape: f32[36,8], index: 1, kind: input, shape index: {}]   ;;  %s2506_s2 = inlined_call_operand.vmem [shape: f32[36,8], index: 2, kind: input, shape index: {}]   ;;  %s2507_s3 = inlined_call_operand.vmem [shape: f32[2,64,8], index: 3, kind: output, shape index: {0}]   ;;  %s2508_s4 = inlined_call_operand.hbm [shape: f32[2,1,8], index: 4, kind: output, shape index: {1}]   ;;  %s2509_s5 = inlined_call_operand.hbm [shape: f32[2,1,8], index: 5, kind: output, shape index: {2}]   ;;  %s2510_s6 = inlined_call_operand.vmem [shape: f32[2,64,8], index: 6, kind: output, shape index: {3}]   ;;  %s2511_s7 = inlined_call_operand.hbm [shape: f32[2,1,8], index: 7, kind: output, shape index: {4}]   ;;  %s2512_s8 = inlined_call_operand.hbm [shape: f32[2,1,8], index: 8, kind: output, shape index: {5}]  }
   0x1   :  { %2524 = sst [smem:[#allocation12_spill]] %s2504_s0 }
   0x2   :  { %2525 = sst [smem:[#allocation13_spill]] %s2505_s1 }
   0x3   :  { %2526 = sst [smem:[#allocation14_spill]] %s2506_s2 }
   0x4   :  { %2527 = sst [smem:[#allocation15_spill]] %s2507_s3 }
   0x5   :  { %2528 = sst [smem:[#allocation16_spill]] %s2510_s6 }
   0x6   :  { %14 = vsyncpa [#allocation3], 0 }
   0x7   :  { %16 = vsyncpa [#allocation3 + $0x1], 0 }
   0x8   :  { %17 = vsyncpa [#allocation5], 0 }
   0x9   :  { %19 = vsyncpa [#allocation5 + $0x1], 0 }
   0xa   :  { %20 = vsyncpa [#allocation8], 0 }
   0xb   :  { %22 = vsyncpa [#allocation8 + $0x1], 0  ;;  %s1842_s27 = smov 0   ;;  %s1844_s28 = smov 0  }
   0xc   :  { %s1846_s29 = smov 0   ;;  %s1848_s30 = smov 0  }
   0xd LB: > { %s1863_s9 = sadd.s32 4294967295, %s1783_s30   ;;  %s2513_s10 = sadd.s32 4294967294, %s1783_s30   ;;  %s1783_s30 = sphi %s1848_s30, %s2547_s30   ;;  %s1779_s29 = sphi %s1846_s29, %s2546_s29   ;;  %s1775_s28 = sphi %s1844_s28, %s2545_s28   ;;  %s1771_s27 = sphi %s1842_s27, %s2544_s27  }
   0xe   : > { %s1867_s11 = sadd.s32 1, %s1783_s30   ;;  %s129_s12 = sadd.s32 1, %s1779_s29 }
   0xf   : > { %s126_s13 = ssub.s32 %s1783_s30, %s1867_s11  ;;  %p139_p0 = scmp.ne.s32.totalorder %s1779_s29, %s1775_s28 }
  0x10   : > { %p127_p1 = scmp.eq.s32.totalorder %s126_s13, 0  ;;  %p140_p2 = scmp.eq.s32.totalorder %s1863_s9, 1 }
  0x11   : > { %p145_p3 = scmp.ne.s32.totalorder %s1775_s28, %s1771_s27  ;;  %p146_p4 = scmp.eq.s32.totalorder %s2513_s10, 1 }
  0x12   : > { %s1880_s14 = scalar_select %p127_p1, %s1779_s29, %s129_s12  }
  0x13   : > { %p1882_p5 = por %p140_p2, %p139_p0  ;;  %p1886_p6 = por %p146_p4, %p145_p3 }
  0x14   : > { %p1415_p7 = scmp.ge.s32.totalorder %s1783_s30, 1  ;;  %p282_p8 = scmp.lt.s32.totalorder %s1783_s30, 3 }
  0x16   : > { %p283_p9 = pnand %p1415_p7, %p282_p8 }
  0x17   : > { %p337_p10 = scmp.lt.s32.totalorder (!%p283_p9), %s1863_s9, 1  ;;  %s2531_s0 = sld [smem:[#allocation12_spill]] (!%p283_p9)  ;;  %vm396_vm0 = vcmask (!%p283_p9), 1046528   ;;  %vm803_vm1 = vcmask (!%p283_p9), 1043456   ;;  %vm701_vm2 = vcmask (!%p283_p9), 31744   ;;  %vm710_vm3 = vcmask (!%p283_p9), 64512  }
  0x18   : > { %286 = sbr.rel (%p283_p9) target bundleno = 593 (0x251), region = 32  ;;  %s2518_s22 = smov (!%p283_p9), 12   ;;  %vm719_vm4 = vcmask (!%p283_p9), 97280   ;;  %vm728_vm5 = vcmask (!%p283_p9), 130048   ;;  %vm737_vm6 = vcmask (!%p283_p9), 162816   ;;  %vm746_vm7 = vcmask (!%p283_p9), 195584  }
  0x19   : > { %s2514_s23 = smov (!%p283_p9), 4   ;;  %s1787_s24 = smov (!%p283_p9), 8   ;;  %vm755_vm8 = vcmask (!%p283_p9), 228352   ;;  %vm764_vm9 = vcmask (!%p283_p9), 261120   ;;  %vm778_vm10 = vcmask (!%p283_p9), 293888   ;;  %vm941_vm11 = vcmask (!%p283_p9), 57344  }
  0x1a   : > { %s2516_s25 = smov (!%p283_p9), 16   ;;  %s2520_s26 = smov (!%p283_p9), 20  }
  0x1b   : > { %s2532_s1 = sld [smem:[#allocation13_spill]] (!%p283_p9)  ;;  %s2533_s2 = sld [smem:[#allocation14_spill]] (!%p283_p9) }
  0x1c   : > { %s2535_s19 = smov (!%p283_p9), 16   ;;  %s1792_s20 = smov (!%p283_p9), 32  }
  0x1d   : > { %s2537_s10 = smov (!%p283_p9), 20   ;;  %s2538_s3 = sld [smem:[#allocation15_spill]] (!%p283_p9) }
  0x1e   : > { %s2539_s6 = sld [smem:[#allocation16_spill]] (!%p283_p9) }
  0x1f   : > { %s1894_s17 = scalar_select %p337_p10, %s1863_s9, 1 }
  0x21   : > { %s1566_s18 = smul.u32 576, %s1894_s17 }
  0x23   : > { %s1900_s21 = scalar_lea.vmem %s2531_s0, %s1566_s18 }
  0x24   : > { %v1903_v0 = vld [vmem:[%s1900_s21 + $0x130] sm:$0xff]  ;;  %v1910_v2 = vld [vmem:[%s1900_s21] sm:$0xff]  ;;  %v353_v3 = vld [vmem:[%s1900_s21 + $0x8] sm:$0x1] }
  0x25   : > { %v1421_v1 = vld [vmem:[%s1900_s21 + $0x90] sm:$0xff]  ;;  %550 = vrot.lane.b32.xlu1 %v1903_v0, %s2518_s22  ;;  %v1914_v4 = vld [vmem:[%s1900_s21 + $0xa0] sm:$0xff]  ;;  %v397_v5 = vrot.slane %v1910_v2, 1  ;;  %v398_v6 = vrot.slane %v353_v3, 1  ;;  %v355_v8 = vld [vmem:[%s1900_s21 + $0x18] sm:$0x1] }
  0x26   : > { %500 = vrot.lane.b32.xlu0 %v1421_v1, %s2514_s23  ;;  %v1918_v7 = vld [vmem:[%s1900_s21 + $0x10] sm:$0xff]  ;;  %v401_v10 = vrot.slane %v355_v8, 1  ;;  %v1430_v12 = vld [vmem:[%s1900_s21 + $0x120] sm:$0xff]  ;;  %v1431_v14 = vld [vmem:[%s1900_s21 + $0x128] sm:$0x1]  ;;  %v466_v40 = vrot.slane %v1903_v0, 1 }
  0x27   : > { %v400_v9 = vrot.slane %v1918_v7, 1  ;;  %v399_v11 = vsel %vm396_vm0, %v397_v5, %v398_v6  ;;  %v1935_v15 = vld [vmem:[%s1900_s21 + $0x20] sm:$0xff]  ;;  %v463_v16 = vrot.slane %v1430_v12, 1  ;;  %v1446_v17 = vld [vmem:[%s1900_s21 + $0x1b0] sm:$0xff]  ;;  %v464_v19 = vrot.slane %v1431_v14, 1  ;;  %v974_v14 = vld [vmem:[%s2533_s2 + $0x8] sm:$0xff] }
  0x28   : > { %v1939_v18 = vld [vmem:[%s1900_s21 + $0xb0] sm:$0xff]  ;;  %v357_v20 = vld [vmem:[%s1900_s21 + $0x28] sm:$0x1]  ;;  %v1943_v21 = vld [vmem:[%s1900_s21 + $0x160] sm:$0xff]  ;;  %v403_v23 = vrot.slane %v1935_v15, 1 }
  0x29   : > { %524 = vrot.lane.b32.xlu1 %v399_v11, %s1787_s24  ;;  %v1928_v13 = vsel %vm396_vm0, %v400_v9, %v401_v10  ;;  %v1447_v22 = vld [vmem:[%s1900_s21 + $0x1c0] sm:$0xff]  ;;  %v475_v24 = vrot.slane %v1943_v21, 1  ;;  %v1949_v25 = vld [vmem:[%s1900_s21 + $0x170] sm:$0xff]  ;;  %v404_v26 = vrot.slane %v357_v20, 1  ;;  %v1433_v27 = vld [vmem:[%s1900_s21 + $0x138] sm:$0x1]  ;;  %v465_v30 = vsel %vm396_vm0, %v463_v16, %v464_v19 }
  0x2a   : > { %502 = vrot.lane.b32.xlu0 %v1914_v4, %s2514_s23  ;;  %v478_v28 = vrot.slane %v1949_v25, 1  ;;  %v1439_v29 = vld [vmem:[%s1900_s21 + $0x168] sm:$0x1]  ;;  %v1959_v32 = vld [vmem:[%s1900_s21 + $0x60] sm:$0xff]  ;;  %v1441_v34 = vld [vmem:[%s1900_s21 + $0x178] sm:$0x1] }
  0x2b   : > { %v476_v31 = vrot.slane %v1439_v29, 1  ;;  %v365_v33 = vld [vmem:[%s1900_s21 + $0x68] sm:$0x1]  ;;  %v415_v35 = vrot.slane %v1959_v32, 1  ;;  %v479_v37 = vrot.slane %v1441_v34, 1  ;;  %v1965_v38 = vld [vmem:[%s1900_s21 + $0x70] sm:$0xff]  ;;  %v1994_v52 = vsel %vm396_vm0, %v403_v23, %v404_v26 }
  0x2c   : > { %v416_v36 = vrot.slane %v365_v33, 1  ;;  %v367_v39 = vld [vmem:[%s1900_s21 + $0x78] sm:$0x1]  ;;  %v418_v42 = vrot.slane %v1965_v38, 1  ;;  %v1974_v44 = vld [vmem:[%s1900_s21 + $0x180] sm:$0xff]  ;;  %v1977_v45 = vld [vmem:[%s1900_s21 + $0x190] sm:$0xff] }
  0x2d   : > { %526 = vrot.lane.b32.xlu1 %v1928_v13, %s1787_s24  ;;  %v1970_v41 = vsel %vm396_vm0, %v475_v24, %v476_v31  ;;  %v419_v43 = vrot.slane %v367_v39, 1  ;;  %v1982_v46 = vld [vmem:[%s1900_s21 + $0xc0] sm:$0xff]  ;;  %v1988_v48 = vsel %vm396_vm0, %v478_v28, %v479_v37  ;;  %v481_v49 = vrot.slane %v1974_v44, 1  ;;  %v1443_v51 = vld [vmem:[%s1900_s21 + $0x188] sm:$0x1]  ;;  %v1997_v54 = vld [vmem:[%s1900_s21 + $0x30] sm:$0xff] }
  0x2e   : > { %548 = vrot.lane.b32.xlu0 %v1430_v12, %s2518_s22  ;;  %v1985_v47 = vsel %vm396_vm0, %v415_v35, %v416_v36  ;;  %v484_v50 = vrot.slane %v1977_v45, 1  ;;  %v467_v53 = vrot.slane %v1433_v27, 1  ;;  %v482_v56 = vrot.slane %v1443_v51, 1  ;;  %v1445_v57 = vld [vmem:[%s1900_s21 + $0x198] sm:$0x1]  ;;  %v2004_v58 = vld [vmem:[%s1900_s21 + $0x80] sm:$0xff] }
  0x2f   : > { %v2000_v55 = vsel %vm396_vm0, %v418_v42, %v419_v43  ;;  %v359_v59 = vld [vmem:[%s1900_s21 + $0x38] sm:$0x1]  ;;  %v485_v60 = vrot.slane %v1445_v57, 1  ;;  %v489_v61 = vrot.slane %v2004_v58, 1  ;;  %v369_v62 = vld [vmem:[%s1900_s21 + $0x88] sm:$0x1] }
  0x30   : > { %v2010_v63 = vsel %vm396_vm0, %v481_v49, %v482_v56  ;;  %v490_v0 = vrot.slane %v369_v62, 1  ;;  %v468_v3 = vsel %vm396_vm0, %v466_v40, %v467_v53  ;;  %v406_v5 = vrot.slane %v1997_v54, 1  ;;  %v773_v9 = vld [vmem:[%s2532_s1] sm:$0xff]  ;;  %v774_v10 = vld [vmem:[%s2532_s1 + $0x8] sm:$0xff]  ;;  %v775_v20 = vld [vmem:[%s2532_s1 + $0x10] sm:$0xff]  ;;  %s2534_s22 = smov 12  }
  0x31   : > { %504 = vrot.lane.b32.xlu1 %v1939_v18, %s2514_s23  ;;  %v2017_v1 = vsel %vm396_vm0, %v484_v50, %v485_v60  ;;  %v407_v6 = vrot.slane %v359_v59, 1  ;;  %v973_v11 = vld [vmem:[%s2533_s2] sm:$0xff]  ;;  %v1550_v12 = vpack.c.bf16 %v774_v10, %v773_v9  ;;  %v975_v23 = vld [vmem:[%s2533_s2 + $0x10] sm:$0xff]  ;;  %v976_v26 = vld [vmem:[%s2533_s2 + $0x18] sm:$0xff] }
  0x32   : > { %580 = vrot.lane.b32.xlu0 %v1446_v17, %s2516_s25  ;;  %v2022_v8 = vsel %vm396_vm0, %v489_v61, %v490_v0  ;;  %v1434_v17 = vld [vmem:[%s1900_s21 + $0x140] sm:$0xff]  ;;  %v1558_v19 = vpack.c.bf16 %v974_v14, %v973_v11  ;;  %v1562_v27 = vpack.c.bf16 %v976_v26, %v975_v23  ;;  %v1448_v31 = vld [vmem:[%s1900_s21 + $0x1d0] sm:$0xff]  ;;  %v1435_v33 = vld [vmem:[%s1900_s21 + $0x148] sm:$0x1] }
  0x33   : > { %v2040_v16 = vsel %vm396_vm0, %v406_v5, %v407_v6  ;;  %1551 = vmatprep.subr.bf16.mxu0 %v1550_v12  ;;  %v777_v28 = vld [vmem:[%s2532_s1 + $0x20] sm:$0xf]  ;;  %v1425_v34 = vld [vmem:[%s1900_s21 + $0xd0] sm:$0xff]  ;;  %v470_v36 = vrot.slane %v1435_v33, 1  ;;  %v361_v39 = vld [vmem:[%s1900_s21 + $0x48] sm:$0x1] }
  0x34   : > { %1559 = vmatprep.subr.bf16.mxu1 %v1558_v19  ;;  %1553 = vmatpush3.bf16.msra.mxu0 %v1550_v12  ;;  %v977_v29 = vld [vmem:[%s2533_s2 + $0x20] sm:$0xf]  ;;  %v410_v42 = vrot.slane %v361_v39, 1  ;;  %v2094_v53 = vld [vmem:[%s1900_s21 + $0x50] sm:$0xff]  ;;  %v363_v56 = vld [vmem:[%s1900_s21 + $0x58] sm:$0x1] }
  0x35   : > { %604 = vrot.lane.b32.xlu1 %v465_v30, %s2520_s26  ;;  %1561 = vmatpush3.bf16.msra.mxu1 %v1558_v19  ;;  %v1436_v30 = vld [vmem:[%s1900_s21 + $0x150] sm:$0xff]  ;;  %v1449_v35 = vld [vmem:[%s1900_s21 + $0x1e0] sm:$0xff]  ;;  %v412_v59 = vrot.slane %v2094_v53, 1 }
  0x36   : > { %582 = vrot.lane.b32.xlu0 %v1447_v22, %s2516_s25  ;;  %v776_v22 = vld [vmem:[%s2532_s1 + $0x18] sm:$0xff]  ;;  %1563 = vmatprep.subr.bf16.mxu1 %v1562_v27  ;;  %v2080_v37 = vld [vmem:[%s1900_s21 + $0x40] sm:$0xff]  ;;  %s2536_s25 = smov 4   ;;  %v472_v43 = vrot.slane %v1436_v30, 1  ;;  %v1450_v61 = vld [vmem:[%s1900_s21 + $0x1f0] sm:$0xff] }
  0x37   : > { %v1554_v24 = vpack.c.bf16 %v776_v22, %v775_v20  ;;  %v409_v40 = vrot.slane %v2080_v37, 1  ;;  %v1426_v49 = vld [vmem:[%s1900_s21 + $0xe0] sm:$0xff]  ;;  %v1427_v62 = vld [vmem:[%s1900_s21 + $0xf0] sm:$0xff] }
  0x39   : > { %528 = vrot.lane.b32.xlu1 %v1994_v52, %s1787_s24  ;;  %1555 = vmatprep.subr.bf16.mxu0 %v1554_v24  ;;  %v411_v50 = vsel %vm396_vm0, %v409_v40, %v410_v42 }
  0x3a   : > { %506 = vrot.lane.b32.xlu0 %v1982_v46, %s2514_s23  ;;  %s1790_s23 = smov 24   ;;  %1557 = vmatpush3.bf16.msra.mxu0 %v1554_v24 }
  0x3b   : > { %1565 = vmatpush3.bf16.msra.mxu1 %v1562_v27  ;;  %1514 = vmatprep.subr.msk.mxu0 %vm803_vm1, %v777_v28 }
  0x3c   : > { %1536 = vmatprep.subr.msk.mxu1 %vm803_vm1, %v977_v29 }
  0x3d   : > { %628 = vrot.lane.b32.xlu1 %v1918_v7, %s1790_s23 }
  0x3e   : > { %606 = vrot.lane.b32.xlu0 %v468_v3, %s2520_s26  ;;  %s1791_s26 = smov 28   ;;  %1515 = vmatpush3.msk.msra.mxu0 %vm803_vm1, %v777_v28 }
  0x3f   : > { %1537 = vmatpush3.msk.msra.mxu1 %vm803_vm1, %v977_v29 }
  0x41   : > { %552 = vrot.lane.b32.xlu1 %v1434_v17, %s2534_s22 }
  0x42   : > { %530 = vrot.lane.b32.xlu0 %v2040_v16, %s1787_s24 }
  0x45   : > { %653 = vrot.lane.b32.xlu1 %v1914_v4, %s1791_s26  ;;  %v469_v4 = vrot.slane %v1434_v17, 1 }
  0x46   : > { %630 = vrot.lane.b32.xlu0 %v1935_v15, %s1790_s23 }
  0x49   : > { %584 = vrot.lane.b32.xlu1 %v1448_v31, %s2535_s19 }
  0x4a   : > { %554 = vrot.lane.b32.xlu0 %v1436_v30, %s2534_s22 }
  0x4d   : > { %677 = vrot.lane.b32.xlu1 %v1928_v13, %s1792_s20  ;;  %v1437_v13 = vld [vmem:[%s1900_s21 + $0x158] sm:$0x1] }
  0x4e   : > { %655 = vrot.lane.b32.xlu0 %v1939_v18, %s1791_s26  ;;  %v471_v18 = vsel %vm396_vm0, %v469_v4, %v470_v36  ;;  %v473_v51 = vrot.slane %v1437_v13, 1 }
  0x50   : > { %v474_v57 = vsel %vm396_vm0, %v472_v43, %v473_v51 }
  0x51   : > { %586 = vrot.lane.b32.xlu1 %v1449_v35, %s2535_s19 }
  0x52   : > { %508 = vrot.lane.b32.xlu0 %v1425_v34, %s2536_s25 }
  0x55   : > { %679 = vrot.lane.b32.xlu1 %v1994_v52, %s1792_s20  ;;  %v413_v52 = vrot.slane %v363_v56, 1 }
  0x56   : > { %608 = vrot.lane.b32.xlu0 %v471_v18, %s2537_s10 }
  0x57   : > { %v414_v60 = vsel %vm396_vm0, %v412_v59, %v413_v52 }
  0x59   : > { %532 = vrot.lane.b32.xlu1 %v411_v50, %s1787_s24 }
  0x5a   : > { %510 = vrot.lane.b32.xlu0 %v1426_v49, %s2536_s25 }
  0x5d   : > { %632 = vrot.lane.b32.xlu1 %v1997_v54, %s1790_s23 }
  0x5e   : > { %610 = vrot.lane.b32.xlu0 %v474_v57, %s2537_s10 }
  0x61   : > { %556 = vrot.lane.b32.xlu1 %v1943_v21, %s2534_s22  ;;  %v1451_v21 = vld [vmem:[%s1900_s21 + $0x200] sm:$0xff] }
  0x62   : > { %534 = vrot.lane.b32.xlu0 %v414_v60, %s1787_s24 }
  0x65   : > { %657 = vrot.lane.b32.xlu1 %v1982_v46, %s1791_s26  ;;  %v1453_v46 = vld [vmem:[%s1900_s21 + $0x220] sm:$0xff] }
  0x66   : > { %634 = vrot.lane.b32.xlu0 %v2080_v37, %s1790_s23 }
  0x69   : > { %588 = vrot.lane.b32.xlu1 %v1450_v61, %s2535_s19 }
  0x6a   : > { %558 = vrot.lane.b32.xlu0 %v1949_v25, %s2534_s22  ;;  %v1428_v25 = vld [vmem:[%s1900_s21 + $0x100] sm:$0xff] }
  0x6d   : > { %681 = vrot.lane.b32.xlu1 %v2040_v16, %s1792_s20 }
  0x6e   : > { %659 = vrot.lane.b32.xlu0 %v1425_v34, %s1791_s26 }
  0x71   : > { %590 = vrot.lane.b32.xlu1 %v1451_v21, %s2535_s19 }
  0x72   : > { %512 = vrot.lane.b32.xlu0 %v1427_v62, %s2536_s25 }
  0x75   : > { %683 = vrot.lane.b32.xlu1 %v411_v50, %s1792_s20 }
  0x76   : > { %612 = vrot.lane.b32.xlu0 %v1970_v41, %s2537_s10  ;;  %v1452_v41 = vld [vmem:[%s1900_s21 + $0x210] sm:$0xff] }
  0x79   : > { %536 = vrot.lane.b32.xlu1 %v1985_v47, %s1787_s24 }
  0x7a   : > { %514 = vrot.lane.b32.xlu0 %v1428_v25, %s2536_s25 }
  0x7d   : > { %636 = vrot.lane.b32.xlu1 %v2094_v53, %s1790_s23 }
  0x7e   : > { %614 = vrot.lane.b32.xlu0 %v1988_v48, %s2537_s10  ;;  %v1429_v48 = vld [vmem:[%s1900_s21 + $0x110] sm:$0xff]  ;;  %s1478_s21 = sshll.u32 %s1894_s17, 6  ;;  %s2336_s17 = sand.u32 1, %s1775_s28  }
  0x7f   : > { %s2269_s18 = scalar_lea.vmem %s2539_s6, %s1478_s21  ;;  %s330_s12 = scalar_lea.vmem [#allocation6], %s2336_s17 }
  0x80   : > { %s1213_s13 = sshll.u32 %s330_s12, 4  ;;  %s2523_s1 = scalar_lea.vmem [#allocation7], %s2336_s17  ;;  %s2376_s13 = int_to_ptr.vmem [resolvable:$true] %s1213_s13 }
  0x81   : > { %560 = vrot.lane.b32.xlu1 %v1974_v44, %s2534_s22  ;;  %s2372_s2 = sshll.u32 %s2523_s1, 4  ;;  %s2413_s2 = int_to_ptr.vmem [resolvable:$true] %s2372_s2 }
  0x82   : > { %538 = vrot.lane.b32.xlu0 %v2000_v55, %s1787_s24  ;;  %s311_s24 = scalar_lea.vmem [#allocation2], %s2336_s17 }
  0x85   : > { %661 = vrot.lane.b32.xlu1 %v1426_v49, %s1791_s26 }
  0x86   : > { %638 = vrot.lane.b32.xlu0 %v1959_v32, %s1790_s23 }
  0x89   : > { %592 = vrot.lane.b32.xlu1 %v1452_v41, %s2535_s19 }
  0x8a   : > { %562 = vrot.lane.b32.xlu0 %v1977_v45, %s2534_s22  ;;  %s2264_s22 = scalar_lea.vmem %s2538_s3, %s1478_s21 }
  0x8d   : > { %685 = vrot.lane.b32.xlu1 %v414_v60, %s1792_s20 }
  0x8e   : > { %663 = vrot.lane.b32.xlu0 %v1427_v62, %s1791_s26 }
  0x91   : > { %616 = vrot.lane.b32.xlu1 %v2010_v63, %s2537_s10 }
  0x92   : > { %594 = vrot.lane.b32.xlu0 %v1453_v46, %s2535_s19  ;;  %s2340_s19 = sshll.u32 %s1863_s9, 4 }
  0x93   : > { %s2359_s21 = scalar_lea.hbm %s2508_s4, %s2340_s19  ;;  %s2367_s0 = scalar_lea.hbm %s2511_s7, %s2340_s19 }
  0x95   : > { %618 = vrot.lane.b32.xlu1 %v2017_v1, %s2537_s10 }
  0x96   : > { %687 = vrot.lane.b32.xlu0 %v1985_v47, %s1792_s20 }
  0x97   : > { %v551_v44 = vpop.permute.xlu1 %550 }
  0x98   : > { %v501_v45 = vpop.permute.xlu0 %500 }
  0x99   : > { %642 = vrot.lane.b32.xlu1 %v2004_v58, %s1790_s23 }
  0x9a   : > { %640 = vrot.lane.b32.xlu0 %v1965_v38, %s1790_s23  ;;  %s2349_s23 = scalar_lea.hbm %s2509_s5, %s2340_s19 }
  0x9b   : > { %v525_v3 = vpop.permute.xlu1 %524 }
  0x9c   : > { %v503_v0 = vpop.permute.xlu0 %502 }
  0x9d   : > { %667 = vrot.lane.b32.xlu1 %v1429_v48, %s1791_s26 }
  0x9e   : > { %665 = vrot.lane.b32.xlu0 %v1428_v25, %s1791_s26  ;;  %s1793_s26 = smov [#allocation2]  }
  0x9f   : > { %v527_v47 = vpop.permute.xlu1 %526 }
  0xa0   : > { %v549_v63 = vpop.permute.xlu0 %548 }
  0xa1   : > { %691 = vrot.lane.b32.xlu1 %v2022_v8, %s1792_s20 }
  0xa2   : > { %689 = vrot.lane.b32.xlu0 %v2000_v55, %s1792_s20  ;;  %v702_v55 = vsel %vm701_vm2, %v1910_v2, %v501_v45  ;;  %v703_v2 = vsel %vm701_vm2, %v1918_v7, %v503_v0  ;;  %s2522_s20 = scalar_lea.vmem [#allocation4], %s2336_s17 }
  0xa3   : > { %v505_v5 = vpop.permute.xlu1 %504  ;;  %v711_v8 = vsel %vm710_vm3, %v702_v55, %v525_v3  ;;  %v712_v31 = vsel %vm710_vm3, %v703_v2, %v527_v47  ;;  %s1197_s25 = sshll.u32 %s2522_s20, 4  ;;  %s1633_s20 = sshll.u32 %s1793_s26, 4  ;;  %s2352_s25 = int_to_ptr.vmem [resolvable:$true] %s1197_s25  ;;  %s1634_s20 = int_to_ptr.vmem [resolvable:$false] %s1633_s20 }
  0xa4   : > { %v581_v1 = vpop.permute.xlu0 %580  ;;  %v720_v20 = vsel %vm719_vm4, %v711_v8, %v549_v63  ;;  %v721_v4 = vsel %vm719_vm4, %v712_v31, %v551_v44  ;;  %v704_v60 = vsel %vm701_vm2, %v1935_v15, %v505_v5  ;;  %s1635_s3 = scalar_lea.vmem %s1634_s20, 32 }
  0xa5   : > { %v729_v24 = vsel %vm728_vm5, %v720_v20, %v581_v1 }
  0xa7   : > { %v605_v9 = vpop.permute.xlu1 %604 }
  0xa8   : > { %v583_v6 = vpop.permute.xlu0 %582  ;;  %v738_v26 = vsel %vm737_vm6, %v729_v24, %v605_v9 }
  0xa9   : > { %v730_v36 = vsel %vm728_vm5, %v721_v4, %v583_v6 }
  0xab   : > { %v529_v10 = vpop.permute.xlu1 %528 }
  0xac   : > { %v2166_v58 = vpop.permute.xlu0 %506  ;;  %v713_v61 = vsel %vm710_vm3, %v704_v60, %v529_v10 }
  0xad   : > { %v705_v15 = vsel %vm701_vm2, %v1997_v54, %v2166_v58 }
  0xaf   : > { %v629_v12 = vpop.permute.xlu1 %628 }
  0xb0   : > { %v607_v11 = vpop.permute.xlu0 %606  ;;  %v747_v27 = vsel %vm746_vm7, %v738_v26, %v629_v12 }
  0xb1   : > { %v739_v7 = vsel %vm737_vm6, %v730_v36, %v607_v11 }
  0xb3   : > { %v553_v16 = vpop.permute.xlu1 %552 }
  0xb4   : > { %v2168_v14 = vpop.permute.xlu0 %530  ;;  %v722_v62 = vsel %vm719_vm4, %v713_v61, %v553_v16 }
  0xb5   : > { %v714_v63 = vsel %vm710_vm3, %v705_v15, %v2168_v14 }
  0xb7   : > { %v654_v19 = vpop.permute.xlu1 %653 }
  0xb8   : > { %v631_v17 = vpop.permute.xlu0 %630  ;;  %v756_v28 = vsel %vm755_vm8, %v747_v27, %v654_v19 }
  0xb9   : > { %v748_v39 = vsel %vm746_vm7, %v739_v7, %v631_v17 }
  0xbb   : > { %v585_v23 = vpop.permute.xlu1 %584 }
  0xbc   : > { %v555_v22 = vpop.permute.xlu0 %554  ;;  %v731_v41 = vsel %vm728_vm5, %v722_v62, %v585_v23 }
  0xbd   : > { %v723_v47 = vsel %vm719_vm4, %v714_v63, %v555_v22 }
  0xbf   : > { %v678_v30 = vpop.permute.xlu1 %677 }
  0xc0   : > { %v656_v29 = vpop.permute.xlu0 %655  ;;  %v765_v33 = vsel %vm764_vm9, %v756_v28, %v678_v30 }
  0xc1   : > { %1516 = vmatprep.mubr.msk.f32.mxu0 %vm778_vm10, %v765_v33  ;;  %1538 = vmatprep.mubr.msk.f32.mxu1 %vm778_vm10, %v765_v33  ;;  %v757_v18 = vsel %vm755_vm8, %v748_v39, %v656_v29 }
  0xc3   : > { %v587_v35 = vpop.permute.xlu1 %586 }
  0xc4   : > { %v509_v34 = vpop.permute.xlu0 %508  ;;  %v732_v6 = vsel %vm728_vm5, %v723_v47, %v587_v35 }
  0xc5   : > { %v706_v23 = vsel %vm701_vm2, %v2080_v37, %v509_v34 }
  0xc7   : > { %v680_v42 = vpop.permute.xlu1 %679 }
  0xc8   : > { %v609_v40 = vpop.permute.xlu0 %608  ;;  %v766_v13 = vsel %vm764_vm9, %v757_v18, %v680_v42 }
  0xc9   : > { %1517 = vmatmul.mubr.msk.f32.vlgmr.msra.gmra.mrb[0].mxu0 %vm778_vm10, %v766_v13  ;;  %1539 = vmatmul.mubr.msk.f32.vlgmr.msra.gmra.mrb[0].mxu1 %vm778_vm10, %v766_v13  ;;  %v740_v46 = vsel %vm737_vm6, %v731_v41, %v609_v40 }
  0xcb   : > { %v533_v49 = vpop.permute.xlu1 %532 }
  0xcc   : > { %v511_v43 = vpop.permute.xlu0 %510  ;;  %v715_v24 = vsel %vm710_vm3, %v706_v23, %v533_v49 }
  0xcd   : > { %v707_v37 = vsel %vm701_vm2, %v2094_v53, %v511_v43 }
  0xcf   : > { %v633_v51 = vpop.permute.xlu1 %632 }
  0xd0   : > { %v611_v50 = vpop.permute.xlu0 %610  ;;  %v749_v44 = vsel %vm746_vm7, %v740_v46, %v633_v51 }
  0xd1   : > { %v741_v9 = vsel %vm737_vm6, %v732_v6, %v611_v50 }
  0xd3   : > { %v557_v57 = vpop.permute.xlu1 %556 }
  0xd4   : > { %v535_v56 = vpop.permute.xlu0 %534  ;;  %v724_v26 = vsel %vm719_vm4, %v715_v24, %v557_v57 }
  0xd5   : > { %v716_v34 = vsel %vm710_vm3, %v707_v37, %v535_v56 }
  0xd7   : > { %v658_v52 = vpop.permute.xlu1 %657 }
  0xd8   : > { %v635_v59 = vpop.permute.xlu0 %634  ;;  %v758_v45 = vsel %vm755_vm8, %v749_v44, %v658_v52 }
  0xd9   : > { %v750_v10 = vsel %vm746_vm7, %v741_v9, %v635_v59 }
  0xdb   : > { %v589_v25 = vpop.permute.xlu1 %588 }
  0xdc   : > { %v559_v21 = vpop.permute.xlu0 %558  ;;  %v733_v28 = vsel %vm728_vm5, %v724_v26, %v589_v25 }
  0xdd   : > { %v725_v36 = vsel %vm719_vm4, %v716_v34, %v559_v21 }
  0xdf   : > { %v682_v0 = vpop.permute.xlu1 %681 }
  0xe0   : > { %v660_v48 = vpop.permute.xlu0 %659  ;;  %v767_v3 = vsel %vm764_vm9, %v758_v45, %v682_v0 }
  0xe1   : > { %1519 = vmatprep.mubr.msk.f32.mxu0 %vm778_vm10, %v767_v3  ;;  %1541 = vmatprep.mubr.msk.f32.mxu1 %vm778_vm10, %v767_v3  ;;  %v759_v11 = vsel %vm755_vm8, %v750_v10, %v660_v48 }
  0xe3   : > { %v591_v5 = vpop.permute.xlu1 %590 }
  0xe4   : > { %v513_v1 = vpop.permute.xlu0 %512  ;;  %v734_v18 = vsel %vm728_vm5, %v725_v36, %v591_v5 }
  0xe5   : > { %v708_v56 = vsel %vm701_vm2, %v1959_v32, %v513_v1 }
  0xe7   : > { %v684_v58 = vpop.permute.xlu1 %683 }
  0xe8   : > { %v613_v54 = vpop.permute.xlu0 %612  ;;  %v768_v12 = vsel %vm764_vm9, %v759_v11, %v684_v58 }
  0xe9   : > { %1520 = vmatmul.mubr.msk.f32.gmra.mrb[2].mxu0 %vm778_vm10, %v768_v12  ;;  %1542 = vmatmul.mubr.msk.f32.gmra.mrb[2].mxu1 %vm778_vm10, %v768_v12  ;;  %v742_v29 = vsel %vm737_vm6, %v733_v28, %v613_v54 }
  0xeb   : > { %v537_v16 = vpop.permute.xlu1 %536 }
  0xec   : > { %v515_v14 = vpop.permute.xlu0 %514  ;;  %v717_v59 = vsel %vm710_vm3, %v708_v56, %v537_v16 }
  0xed   : > { %v709_v57 = vsel %vm701_vm2, %v1965_v38, %v515_v14 }
  0xef   : > { %v637_v19 = vpop.permute.xlu1 %636 }
  0xf0   : > { %v615_v17 = vpop.permute.xlu0 %614  ;;  %v751_v30 = vsel %vm746_vm7, %v742_v29, %v637_v19 }
  0xf1   : > { %v743_v40 = vsel %vm737_vm6, %v734_v18, %v615_v17 }
  0xf3   : > { %v561_v8 = vpop.permute.xlu1 %560 }
  0xf4   : > { %v539_v55 = vpop.permute.xlu0 %538  ;;  %v726_v60 = vsel %vm719_vm4, %v717_v59, %v561_v8 }
  0xf5   : > { %v718_v52 = vsel %vm710_vm3, %v709_v57, %v539_v55 }
  0xf7   : > { %v662_v22 = vpop.permute.xlu1 %661 }
  0xf8   : > { %v639_v20 = vpop.permute.xlu0 %638  ;;  %v760_v31 = vsel %vm755_vm8, %v751_v30, %v662_v22 }
  0xf9   : > { %v752_v42 = vsel %vm746_vm7, %v743_v40, %v639_v20 }
  0xfb   : > { %v593_v2 = vpop.permute.xlu1 %592 }
  0xfc   : > { %v563_v27 = vpop.permute.xlu0 %562  ;;  %v735_v25 = vsel %vm728_vm5, %v726_v60, %v593_v2 }
  0xfd   : > { %v727_v61 = vsel %vm719_vm4, %v718_v52, %v563_v27 }
  0xff   : > { %v686_v4 = vpop.permute.xlu1 %685 }
 0x100   : > { %v664_v33 = vpop.permute.xlu0 %663  ;;  %v769_v35 = vsel %vm764_vm9, %v760_v31, %v686_v4 }
 0x101   : > { %1522 = vmatprep.mubr.msk.f32.mxu0 %vm778_vm10, %v769_v35  ;;  %1544 = vmatprep.mubr.msk.f32.mxu1 %vm778_vm10, %v769_v35  ;;  %v761_v13 = vsel %vm755_vm8, %v752_v42, %v664_v33 }
 0x103   : > { %v617_v39 = vpop.permute.xlu1 %616 }
 0x104   : > { %v595_v7 = vpop.permute.xlu0 %594  ;;  %v744_v32 = vsel %vm737_vm6, %v735_v25, %v617_v39 }
 0x105   : > { %v736_v41 = vsel %vm728_vm5, %v727_v61, %v595_v7 }
 0x107   : > { %v619_v53 = vpop.permute.xlu1 %618 }
 0x108   : > { %v688_v49 = vpop.permute.xlu0 %687  ;;  %v745_v46 = vsel %vm737_vm6, %v736_v41, %v619_v53 }
 0x109   : > { %v770_v43 = vsel %vm764_vm9, %v761_v13, %v688_v49 }
 0x10a   : > { %1523 = vmatmul.mubr.msk.f32.gmra.mrb[4].mxu0 %vm778_vm10, %v770_v43  ;;  %1545 = vmatmul.mubr.msk.f32.gmra.mrb[4].mxu1 %vm778_vm10, %v770_v43 }
 0x10b   : > { %v643_v51 = vpop.permute.xlu1 %642 }
 0x10c   : > { %v641_v50 = vpop.permute.xlu0 %640  ;;  %v754_v44 = vsel %vm746_vm7, %v745_v46, %v643_v51 }
 0x10d   : > { %v753_v38 = vsel %vm746_vm7, %v744_v32, %v641_v50 }
 0x10f   : > { %v668_v21 = vpop.permute.xlu1 %667 }
 0x110   : > { %v666_v62 = vpop.permute.xlu0 %665  ;;  %v763_v48 = vsel %vm755_vm8, %v754_v44, %v668_v21 }
 0x111   : > { %v762_v45 = vsel %vm755_vm8, %v753_v38, %v666_v62 }
 0x113   : > { %v692_v3 = vpop.permute.xlu1 %691 }
 0x114   : > { %v690_v0 = vpop.permute.xlu0 %689  ;;  %v772_v63 = vsel %vm764_vm9, %v763_v48, %v692_v3 }
 0x115   : > { %v771_v15 = vsel %vm764_vm9, %v762_v45, %v690_v0 }
 0x116   : > { %1525 = vmatprep.mubr.msk.f32.mxu0 %vm778_vm10, %v771_v15  ;;  %1547 = vmatprep.mubr.msk.f32.mxu1 %vm778_vm10, %v771_v15 }
 0x117   : > { %1526 = vmatmul.mubr.msk.f32.gmra.mrb[6].mxu0 %vm778_vm10, %v772_v63  ;;  %1548 = vmatmul.mubr.msk.f32.gmra.mrb[6].mxu1 %vm778_vm10, %v772_v63 }
 0x19c   : > { %v1518_v47 = vpop.f32.mrb[0].mxu0  ;;  %v1540_v1 = vpop.f32.mrb[0].mxu1 }
 0x19d   : > { %913 = vst.msk [vmem:[%s2264_s22 + $0x8] sm:$0xff] %vm710_vm3, %v1518_v47  ;;  %v921_v5 = vsel %vm710_vm3, %v1518_v47, 0.0  ;;  %v944_v6 = vmul.f32 %v1518_v47, %v1518_v47  ;;  %1087 = vst.msk [vmem:[%s2269_s18 + $0x8] sm:$0xff] %vm710_vm3, %v1540_v1  ;;  %v1095_v9 = vsel %vm710_vm3, %v1540_v1, 0.0  ;;  %v1117_v10 = vmul.f32 %v1540_v1, %v1540_v1  ;;  %v873_v11 = vpop.f32.mrb[1].mxu0  ;;  %v1047_v54 = vpop.f32.mrb[1].mxu1 }
 0x19e   : > { %912 = vst.msk [vmem:[%s2264_s22] sm:$0xff] %vm710_vm3, %v873_v11  ;;  %v920_v58 = vsel %vm710_vm3, %v873_v11, 0.0  ;;  %v943_v12 = vmul.f32 %v873_v11, %v873_v11  ;;  %1086 = vst.msk [vmem:[%s2269_s18] sm:$0xff] %vm710_vm3, %v1047_v54  ;;  %v1094_v14 = vsel %vm710_vm3, %v1047_v54, 0.0  ;;  %v1116_v16 = vmul.f32 %v1047_v54, %v1047_v54 }
 0x19f   : > { %v952_v17 = vsel %vm710_vm3, %v944_v6, 0.0  ;;  %v1125_v19 = vsel %vm710_vm3, %v1117_v10, 0.0  ;;  %v922_v55 = vadd.f32 %v921_v5, %v920_v58  ;;  %v1096_v8 = vadd.f32 %v1095_v9, %v1094_v14 }
 0x1a0   : > { %v951_v20 = vsel %vm710_vm3, %v943_v12, 0.0  ;;  %v1124_v22 = vsel %vm710_vm3, %v1116_v16, 0.0 }
 0x1a1   : > { %v953_v23 = vadd.f32 %v952_v17, %v951_v20  ;;  %v1126_v24 = vadd.f32 %v1125_v19, %v1124_v22 }
 0x1bc   : > { %v1521_v26 = vpop.f32.mrb[2].mxu0  ;;  %v1543_v27 = vpop.f32.mrb[2].mxu1 }
 0x1bd   : > { %915 = vst.msk [vmem:[%s2264_s22 + $0x18] sm:$0xff] %vm710_vm3, %v1521_v26  ;;  %v946_v2 = vmul.f32 %v1521_v26, %v1521_v26  ;;  %1089 = vst.msk [vmem:[%s2269_s18 + $0x18] sm:$0xff] %vm710_vm3, %v1543_v27  ;;  %v1119_v28 = vmul.f32 %v1543_v27, %v1543_v27  ;;  %v883_v29 = vpop.f32.mrb[3].mxu0  ;;  %v1057_v30 = vpop.f32.mrb[3].mxu1  ;;  %v925_v36 = vsel %vm710_vm3, %v1521_v26, 0.0  ;;  %v1099_v7 = vsel %vm710_vm3, %v1543_v27, 0.0 }
 0x1be   : > { %914 = vst.msk [vmem:[%s2264_s22 + $0x10] sm:$0xff] %vm710_vm3, %v883_v29  ;;  %v923_v31 = vsel %vm710_vm3, %v883_v29, 0.0  ;;  %v945_v33 = vmul.f32 %v883_v29, %v883_v29  ;;  %1088 = vst.msk [vmem:[%s2269_s18 + $0x10] sm:$0xff] %vm710_vm3, %v1057_v30  ;;  %v1097_v4 = vsel %vm710_vm3, %v1057_v30, 0.0  ;;  %v1118_v35 = vmul.f32 %v1057_v30, %v1057_v30 }
 0x1bf   : > { %v924_v37 = vadd.f32 %v923_v31, %v922_v55  ;;  %v1098_v34 = vadd.f32 %v1097_v4, %v1096_v8  ;;  %v956_v53 = vsel %vm710_vm3, %v946_v2, 0.0  ;;  %v1129_v43 = vsel %vm710_vm3, %v1119_v28, 0.0 }
 0x1c0   : > { %v954_v39 = vsel %vm710_vm3, %v945_v33, 0.0  ;;  %v1127_v18 = vsel %vm710_vm3, %v1118_v35, 0.0 }
 0x1c1   : > { %v955_v40 = vadd.f32 %v954_v39, %v953_v23  ;;  %v1128_v42 = vadd.f32 %v1127_v18, %v1126_v24  ;;  %v926_v13 = vadd.f32 %v925_v36, %v924_v37  ;;  %v1100_v49 = vadd.f32 %v1099_v7, %v1098_v34 }
 0x1c3   : > { %v957_v50 = vadd.f32 %v956_v53, %v955_v40  ;;  %v1130_v51 = vadd.f32 %v1129_v43, %v1128_v42 }
 0x1dd   : > { %v1524_v56 = vpop.f32.mrb[4].mxu0  ;;  %v1546_v57 = vpop.f32.mrb[4].mxu1 }
 0x1de   : > { %917 = vst.msk [vmem:[%s2264_s22 + $0x28] sm:$0xff] %vm710_vm3, %v1524_v56  ;;  %v948_v59 = vmul.f32 %v1524_v56, %v1524_v56  ;;  %1091 = vst.msk [vmem:[%s2269_s18 + $0x28] sm:$0xff] %vm710_vm3, %v1546_v57  ;;  %v1121_v52 = vmul.f32 %v1546_v57, %v1546_v57  ;;  %v893_v60 = vpop.f32.mrb[5].mxu0  ;;  %v1067_v61 = vpop.f32.mrb[5].mxu1  ;;  %v929_v38 = vsel %vm710_vm3, %v1524_v56, 0.0  ;;  %v1103_v44 = vsel %vm710_vm3, %v1546_v57, 0.0 }
 0x1df   : > { %916 = vst.msk [vmem:[%s2264_s22 + $0x20] sm:$0xff] %vm710_vm3, %v893_v60  ;;  %v927_v62 = vsel %vm710_vm3, %v893_v60, 0.0  ;;  %v947_v21 = vmul.f32 %v893_v60, %v893_v60  ;;  %1090 = vst.msk [vmem:[%s2269_s18 + $0x20] sm:$0xff] %vm710_vm3, %v1067_v61  ;;  %v1101_v25 = vsel %vm710_vm3, %v1067_v61, 0.0  ;;  %v1120_v41 = vmul.f32 %v1067_v61, %v1067_v61 }
 0x1e0   : > { %v928_v32 = vadd.f32 %v927_v62, %v926_v13  ;;  %v1102_v46 = vadd.f32 %v1101_v25, %v1100_v49  ;;  %v960_v47 = vsel %vm710_vm3, %v948_v59, 0.0  ;;  %v1133_v1 = vsel %vm710_vm3, %v1121_v52, 0.0 }
 0x1e1   : > { %v958_v45 = vsel %vm710_vm3, %v947_v21, 0.0  ;;  %v1131_v48 = vsel %vm710_vm3, %v1120_v41, 0.0 }
 0x1e2   : > { %v959_v0 = vadd.f32 %v958_v45, %v957_v50  ;;  %v1132_v3 = vadd.f32 %v1131_v48, %v1130_v51  ;;  %v930_v15 = vadd.f32 %v929_v38, %v928_v32  ;;  %v1104_v63 = vadd.f32 %v1103_v44, %v1102_v46 }
 0x1e4   : > { %v961_v5 = vadd.f32 %v960_v47, %v959_v0  ;;  %v1134_v6 = vadd.f32 %v1133_v1, %v1132_v3 }
 0x1ea   : > { %v1527_v9 = vpop.f32.mrb[6].mxu0  ;;  %v1549_v10 = vpop.f32.mrb[6].mxu1 }
 0x1eb   : > { %919 = vst.msk [vmem:[%s2264_s22 + $0x38] sm:$0xff] %vm710_vm3, %v1527_v9  ;;  %v950_v11 = vmul.f32 %v1527_v9, %v1527_v9  ;;  %1093 = vst.msk [vmem:[%s2269_s18 + $0x38] sm:$0xff] %vm710_vm3, %v1549_v10  ;;  %v1123_v54 = vmul.f32 %v1549_v10, %v1549_v10  ;;  %v903_v58 = vpop.f32.mrb[7].mxu0  ;;  %v1077_v12 = vpop.f32.mrb[7].mxu1  ;;  %v933_v20 = vsel %vm710_vm3, %v1527_v9, 0.0  ;;  %v1107_v22 = vsel %vm710_vm3, %v1549_v10, 0.0 }
 0x1ec   : > { %918 = vst.msk [vmem:[%s2264_s22 + $0x30] sm:$0xff] %vm710_vm3, %v903_v58  ;;  %v931_v14 = vsel %vm710_vm3, %v903_v58, 0.0  ;;  %v949_v16 = vmul.f32 %v903_v58, %v903_v58  ;;  %1092 = vst.msk [vmem:[%s2269_s18 + $0x30] sm:$0xff] %vm710_vm3, %v1077_v12  ;;  %v1105_v17 = vsel %vm710_vm3, %v1077_v12, 0.0  ;;  %v1122_v19 = vmul.f32 %v1077_v12, %v1077_v12  ;;  %s1184_s22 = sshll.u32 %s311_s24, 4  ;;  %s1152_s18 = scalar_lea.sflag [#allocation3], %s2336_s17  ;;  %s2361_s22 = int_to_ptr.vmem [resolvable:$true] %s1184_s22 }
 0x1ed   : > { %v932_v55 = vadd.f32 %v931_v14, %v930_v15  ;;  %v1106_v8 = vadd.f32 %v1105_v17, %v1104_v63  ;;  %v964_v29 = vsel %vm710_vm3, %v950_v11, 0.0  ;;  %v1137_v30 = vsel %vm710_vm3, %v1123_v54, 0.0  ;;  %s1629_s10 = scalar_lea.vmem %s2361_s22, 16  ;;  %p1636_p0 = scmp.lt.s32.totalorder %s2361_s22, %s1634_s20 }
 0x1ee   : > { %v962_v23 = vsel %vm710_vm3, %v949_v16, 0.0  ;;  %v1135_v24 = vsel %vm710_vm3, %v1122_v19, 0.0  ;;  %p1630_p11 = scmp.ne.s32.totalorder %s2361_s22, %s1629_s10  ;;  %p1637_p1 = scmp.lt.s32.totalorder %s1635_s3, %s1629_s10 }
 0x1ef   : > { %v934_v26 = vadd.f32 %v933_v20, %v932_v55  ;;  %v963_v27 = vadd.f32 %v962_v23, %v961_v5  ;;  %v1108_v2 = vadd.f32 %v1107_v22, %v1106_v8  ;;  %v1136_v28 = vadd.f32 %v1135_v24, %v1134_v6 }
 0x1f0   : > { %p1631_p12 = pnand %p1630_p11, %p1882_p5  ;;  %p1638_p2 = por %p1637_p1, %p1636_p0 }
 0x1f1   : > { %v935_v31 = vrot.slane %v934_v26, 4  ;;  %v965_v33 = vadd.f32 %v964_v29, %v963_v27  ;;  %v1109_v4 = vrot.slane %v1108_v2, 4  ;;  %v1138_v35 = vadd.f32 %v1137_v30, %v1136_v28 }
 0x1f2   : > { %p1632_p13 = pneg %p1631_p12 }
 0x1f3   : > { %v936_v37 = vadd.f32 %v935_v31, %v934_v26  ;;  %v966_v34 = vrot.slane %v965_v33, 4  ;;  %v1110_v36 = vadd.f32 %v1109_v4, %v1108_v2  ;;  %v1139_v7 = vrot.slane %v1138_v35, 4 }
 0x1f4   : > { %p1639_p3 = pnand %p1638_p2, %p1632_p13 }
 0x1f5   : > { %v937_v39 = vrot.slane %v936_v37, 2  ;;  %v967_v18 = vadd.f32 %v966_v34, %v965_v33  ;;  %v1111_v40 = vrot.slane %v1110_v36, 2  ;;  %v1140_v42 = vadd.f32 %v1139_v7, %v1138_v35 }
 0x1f7   : > { %v938_v13 = vadd.f32 %v937_v39, %v936_v37  ;;  %v968_v49 = vrot.slane %v967_v18, 2  ;;  %v1112_v53 = vadd.f32 %v1111_v40, %v1110_v36  ;;  %v1141_v43 = vrot.slane %v1140_v42, 2 }
 0x1f9   : > { %v1113_v50 = vrot.slane %v1112_v53, 1  ;;  %v969_v51 = vadd.f32 %v968_v49, %v967_v18  ;;  %v939_v56 = vrot.slane %v938_v13, 1  ;;  %v1142_v57 = vadd.f32 %v1141_v43, %v1140_v42 }
 0x1fb   : > { %v970_v59 = vrot.slane %v969_v51, 1  ;;  %v940_v52 = vadd.f32 %v939_v56, %v938_v13  ;;  %v1114_v60 = vadd.f32 %v1113_v50, %v1112_v53  ;;  %v1143_v61 = vrot.slane %v1142_v57, 1 }
 0x1fd   : > { %v971_v62 = vadd.f32 %v970_v59, %v969_v51  ;;  %942 = vst.msk [vmem:[%s311_s24] sm:$0x1] %vm941_vm11, %v940_v52  ;;  %1115 = vst.msk [vmem:[%s330_s12] sm:$0x1] %vm941_vm11, %v1114_v60  ;;  %v1144_v21 = vadd.f32 %v1143_v61, %v1142_v57 }
 0x1fe   : > { %1642 = shalt.err (!%p1639_p3)
}
 0x1ff   : > { %s1643_s24 = scalar_lea.hbm %s2359_s21, 16  ;;  %s1647_s26 = scalar_lea.hbm %s2508_s4, 32 }
 0x200   : > { %p1644_p4 = scmp.ne.s32.totalorder %s2359_s21, %s1643_s24  ;;  %p1648_p9 = scmp.lt.u32.totalorder %s2359_s21, %s2508_s4 }
 0x201   : > { %p1649_p10 = scmp.lt.u32.totalorder %s1647_s26, %s1643_s24  ;;  %p1651_p12 = scmp.lt.u32.totalorder %s1643_s24, %s2359_s21 }
 0x202   : > { %p1645_p7 = pnand %p1644_p4, %p1882_p5 }
 0x203   : > { %p1650_p11 = por %p1649_p10, %p1648_p9 }
 0x204   : > { %p1646_p8 = pneg %p1645_p7 }
 0x205   : > { %p1652_p13 = por %p1651_p12, %p1650_p11 }
 0x207   : > { %p1653_p0 = pnand %p1652_p13, %p1646_p8 }
 0x209   : > { %1656 = shalt.err (!%p1653_p0)
}
 0x20a   : > { %1567 = dma.vmem_to_hbm [thread:$0]  (%p1882_p5), %s2361_s22, 16, %s2359_s21, %s1152_s18  }
 0x20b   : > { %s2540_s1 = scalar_lea.vmem [#allocation4], %s2336_s17  ;;  %s2541_s3 = scalar_lea.vmem [#allocation7], %s2336_s17 }
 0x20c   : > { %972 = vst.msk [vmem:[%s2540_s1] sm:$0x1] %vm941_vm11, %v971_v62  ;;  %1145 = vst.msk [vmem:[%s2541_s3] sm:$0x1] %vm941_vm11, %v1144_v21  ;;  %s2410_s24 = scalar_lea.hbm %s2512_s8, %s2340_s19  ;;  %s2542_s12 = sand.u32 1, %s1863_s9  }
 0x20d   : > { %s2417_s26 = scalar_lea.sflag [#allocation5], %s2542_s12  ;;  %s1657_s20 = scalar_lea.vmem %s2352_s25, 16 }
 0x20e   : > { %p1658_p1 = scmp.ne.s32.totalorder %s2352_s25, %s1657_s20  ;;  %s1794_s22 = smov [#allocation4]  }
 0x20f   : > { %s1661_s21 = sshll.u32 %s1794_s22, 4  ;;  %s1662_s21 = int_to_ptr.vmem [resolvable:$false] %s1661_s21 }
 0x210   : > { %p1659_p2 = pnand %p1658_p1, %p1882_p5  ;;  %s1663_s18 = scalar_lea.vmem %s1662_s21, 32 }
 0x211   : > { %p1664_p4 = scmp.lt.s32.totalorder %s2352_s25, %s1662_s21  ;;  %p1665_p7 = scmp.lt.s32.totalorder %s1663_s18, %s1657_s20 }
 0x212   : > { %p1660_p3 = pneg %p1659_p2 }
 0x213   : > { %p1666_p8 = por %p1665_p7, %p1664_p4 }
 0x215   : > { %p1667_p9 = pnand %p1666_p8, %p1660_p3 }
 0x217   : > { %1670 = shalt.err (!%p1667_p9)
}
 0x218   : > { %s1671_s9 = scalar_lea.hbm %s2349_s23, 16  ;;  %s1675_s3 = scalar_lea.hbm %s2509_s5, 32 }
 0x219   : > { %p1672_p10 = scmp.ne.s32.totalorder %s2349_s23, %s1671_s9  ;;  %p1676_p13 = scmp.lt.u32.totalorder %s2349_s23, %s2509_s5 }
 0x21a   : > { %p1677_p0 = scmp.lt.u32.totalorder %s1675_s3, %s1671_s9  ;;  %p1679_p2 = scmp.lt.u32.totalorder %s1671_s9, %s2349_s23 }
 0x21b   : > { %p1673_p11 = pnand %p1672_p10, %p1882_p5 }
 0x21c   : > { %p1678_p1 = por %p1677_p0, %p1676_p13 }
 0x21d   : > { %p1674_p12 = pneg %p1673_p11 }
 0x21e   : > { %p1680_p3 = por %p1679_p2, %p1678_p1 }
 0x220   : > { %p1681_p4 = pnand %p1680_p3, %p1674_p12 }
 0x222   : > { %1684 = shalt.err (!%p1681_p4)
}
 0x223   : > { %1568 = dma.vmem_to_hbm [thread:$0]  (%p1882_p5), %s2352_s25, 16, %s2349_s23, %s2417_s26  }
 0x224   : > { %s1685_s12 = scalar_lea.vmem %s2376_s13, 16  ;;  %s1795_s20 = smov [#allocation6]  }
 0x225   : > { %p1686_p7 = scmp.ne.s32.totalorder %s2376_s13, %s1685_s12  ;;  %s1689_s22 = sshll.u32 %s1795_s20, 4  ;;  %s1690_s22 = int_to_ptr.vmem [resolvable:$false] %s1689_s22 }
 0x226   : > { %s1691_s21 = scalar_lea.vmem %s1690_s22, 32  ;;  %p1692_p10 = scmp.lt.s32.totalorder %s2376_s13, %s1690_s22 }
 0x227   : > { %p1687_p8 = pnand %p1686_p7, %p1882_p5  ;;  %p1693_p11 = scmp.lt.s32.totalorder %s1691_s21, %s1685_s12 }
 0x229   : > { %p1688_p9 = pneg %p1687_p8  ;;  %p1694_p12 = por %p1693_p11, %p1692_p10 }
 0x22b   : > { %p1695_p13 = pnand %p1694_p12, %p1688_p9 }
 0x22d   : > { %1698 = shalt.err (!%p1695_p13)
}
 0x22e   : > { %s1699_s25 = scalar_lea.hbm %s2367_s0, 16  ;;  %s1703_s9 = scalar_lea.hbm %s2511_s7, 32 }
 0x22f   : > { %p1700_p0 = scmp.ne.s32.totalorder %s2367_s0, %s1699_s25  ;;  %p1704_p3 = scmp.lt.u32.totalorder %s2367_s0, %s2511_s7 }
 0x230   : > { %p1705_p4 = scmp.lt.u32.totalorder %s1703_s9, %s1699_s25  ;;  %p1707_p8 = scmp.lt.u32.totalorder %s1699_s25, %s2367_s0 }
 0x231   : > { %p1701_p1 = pnand %p1700_p0, %p1882_p5 }
 0x232   : > { %p1706_p7 = por %p1705_p4, %p1704_p3 }
 0x233   : > { %p1702_p2 = pneg %p1701_p1 }
 0x234   : > { %p1708_p9 = por %p1707_p8, %p1706_p7 }
 0x236   : > { %p1709_p10 = pnand %p1708_p9, %p1702_p2 }
 0x238   : > { %1712 = shalt.err (!%p1709_p10)
}
 0x239   : > { %1569 = dma.vmem_to_hbm [thread:$0]  (%p1882_p5), %s2376_s13, 16, %s2367_s0, %s2417_s26  }
 0x23a   : > { %s1169_s3 = scalar_lea.sflag [#allocation8], %s2336_s17  ;;  %s1713_s6 = scalar_lea.vmem %s2413_s2, 16 }
 0x23b   : > { %p1714_p11 = scmp.ne.s32.totalorder %s2413_s2, %s1713_s6  ;;  %s1796_s10 = smov [#allocation7]  }
 0x23c   : > { %s1717_s12 = sshll.u32 %s1796_s10, 4  ;;  %s1718_s12 = int_to_ptr.vmem [resolvable:$false] %s1717_s12 }
 0x23d   : > { %p1715_p12 = pnand %p1714_p11, %p1882_p5  ;;  %s1719_s20 = scalar_lea.vmem %s1718_s12, 32 }
 0x23e   : > { %p1720_p0 = scmp.lt.s32.totalorder %s2413_s2, %s1718_s12  ;;  %p1721_p1 = scmp.lt.s32.totalorder %s1719_s20, %s1713_s6 }
 0x23f   : > { %p1716_p13 = pneg %p1715_p12 }
 0x240   : > { %p1722_p2 = por %p1721_p1, %p1720_p0 }
 0x242   : > { %p1723_p3 = pnand %p1722_p2, %p1716_p13 }
 0x244   : > { %1726 = shalt.err (!%p1723_p3)
}
 0x245   : > { %s1727_s0 = scalar_lea.hbm %s2410_s24, 16  ;;  %s1731_s26 = scalar_lea.hbm %s2512_s8, 32 }
 0x246   : > { %p1728_p4 = scmp.ne.s32.totalorder %s2410_s24, %s1727_s0  ;;  %p1732_p9 = scmp.lt.u32.totalorder %s2410_s24, %s2512_s8 }
 0x247   : > { %p1733_p10 = scmp.lt.u32.totalorder %s1731_s26, %s1727_s0  ;;  %p1735_p12 = scmp.lt.u32.totalorder %s1727_s0, %s2410_s24 }
 0x248   : > { %p1729_p7 = pnand %p1728_p4, %p1882_p5 }
 0x249   : > { %p1734_p11 = por %p1733_p10, %p1732_p9 }
 0x24a   : > { %p1730_p8 = pneg %p1729_p7 }
 0x24b   : > { %p1736_p13 = por %p1735_p12, %p1734_p11 }
 0x24d   : > { %p1737_p0 = pnand %p1736_p13, %p1730_p8 }
 0x24f   : > { %1740 = shalt.err (!%p1737_p0)
}
 0x250   : > { %1570 = dma.vmem_to_hbm [thread:$0]  (%p1882_p5), %s2413_s2, 16, %s2410_s24, %s1169_s3  }
 0x251 PF: > { %p1588_p1 = scmp.ge.s32.totalorder %s1783_s30, 2  ;;  %s1246_s25 = sand.u32 1, %s1771_s27  }
 0x252   : > { %s1247_s23 = scalar_lea.sflag [#allocation3], %s1246_s25 }
 0x253   : > { %p1576_p2 = pnand %p1588_p1, %p1886_p6 }
 0x255   : > { %1758 = dma.done.wait (!%p1576_p2), %s1247_s23, 16  }
 0x256   : > { %1760 = vsyncadd (!%p1576_p2), %s1247_s23, 4294967280  ;;  %s2543_s18 = sadd.s32 4294967294, %s1783_s30  }
 0x257   : > { %s1254_s9 = sand.u32 1, %s2543_s18  }
 0x258   : > { %s1255_s19 = scalar_lea.sflag [#allocation5], %s1254_s9 }
 0x259   : > { %1762 = dma.done.wait (!%p1576_p2), %s1255_s19, 32  }
 0x25a   : > { %1764 = vsyncadd (!%p1576_p2), %s1255_s19, 4294967264  ;;  %s1279_s15 = scalar_lea.sflag [#allocation8], %s1246_s25 }
 0x25b   : > { %1766 = dma.done.wait (!%p1576_p2), %s1279_s15, 16  }
 0x25c   : > { %1768 = vsyncadd (!%p1576_p2), %s1279_s15, 4294967280  ;;  %p25_p5 = scmp.ge.s32.totalorder %s1867_s11, 4   ;;  %s2544_s27 = smov %s1775_s28 }
 0x25d   : > { %s2545_s28 = smov %s1779_s29  ;;  %s2546_s29 = smov %s1880_s14 }
 0x25e   : > { %s2547_s30 = smov %s1867_s11  ;;  %27 = sbr.rel (!%p25_p5) target bundleno = 13 (0xd), region = 143 }
 0x265   :  { %1283 = vsyncpa [#allocation3], 1 }
 0x266   :  { %1285 = vsyncpa [#allocation3 + $0x1], 1 }
 0x267   :  { %1286 = vsyncpa [#allocation5], 1 }
 0x268   :  { %1288 = vsyncpa [#allocation5 + $0x1], 1 }
 0x269   :  { %1289 = vsyncpa [#allocation8], 1 }
 0x26a   :  { %1291 = vsyncpa [#allocation8 + $0x1], 1 }

</bundles_post_ra>
